<compile_context>
chip_gen: v7x
topology: tpu7x:2x2x1
jax: 0.10.0
libtpu: 0.0.40
codegen_flags: <defaults>
</compile_context>

<pallas_src>
import jax
import jax.numpy as jnp
from jax.experimental import pallas as pl
from jax.experimental.pallas import tpu as pltpu


# ---------------------------------------------------------------------------
# In-kernel helpers (traced inside the Pallas kernel)
# ---------------------------------------------------------------------------
def _fill_halo(ref, value):
    """Initialize only the 1-pixel border frame of a (Hp, Wp, C) scratch.

    The interior is fully overwritten each grid step, so the previous
    full-buffer fill double-wrote the largest buffers for nothing.
    """
    hp, wp, c = ref.shape
    ref[0:1, :, :] = jnp.full((1, wp, c), value, jnp.float32)
    ref[hp - 1:hp, :, :] = jnp.full((1, wp, c), value, jnp.float32)
    ref[:, 0:1, :] = jnp.full((hp, 1, c), value, jnp.float32)
    ref[:, wp - 1:wp, :] = jnp.full((hp, 1, c), value, jnp.float32)


def _conv3x3_s2_relu(xpad_ref, w_ref, bias, hout, wout):
    """3x3 / stride-2 conv + bias + ReLU (BN scale pre-folded into w_ref).

    xpad_ref : (Hp, Wp, Cin) halo-padded VMEM scratch (Hp = 2*hout + 2).
    w_ref    : (3, 3, Cin, Cout) scale-folded weights (HWIO).
    bias     : (1, Cout) fused eval-BN bias (seeds the accumulator).
    returns  : (hout*wout, Cout) float32, post-ReLU.
    """
    cin = xpad_ref.shape[-1]
    acc = None
    for dh in range(3):
        for dw in range(3):
            tap = xpad_ref[pl.ds(dh, hout, 2), pl.ds(dw, wout, 2), :]
            p = jnp.dot(tap.reshape(hout * wout, cin), w_ref[dh, dw],
                        preferred_element_type=jnp.float32)
            acc = (p + bias) if acc is None else (acc + p)
    return jnp.maximum(acc, 0.0)


def _conv3x3_s1_relu(xpad_ref, w_ref, bias, hout, wout):
    """3x3 / stride-1 conv + bias + ReLU; slices the Ref per tap (no full load)."""
    cin = xpad_ref.shape[-1]
    acc = None
    for dh in range(3):
        for dw in range(3):
            tap = xpad_ref[dh:dh + hout, dw:dw + wout, :]
            p = jnp.dot(tap.reshape(hout * wout, cin), w_ref[dh, dw],
                        preferred_element_type=jnp.float32)
            acc = (p + bias) if acc is None else (acc + p)
    return jnp.maximum(acc, 0.0)


def _maxpool3x3_s2(xpad_ref, hout, wout):
    """3x3 / stride-2 / pad-1 max pool on a -inf halo-padded VMEM scratch."""
    c = xpad_ref.shape[-1]
    out = None
    for dh in range(3):
        for dw in range(3):
            tap = xpad_ref[pl.ds(dh, hout, 2), pl.ds(dw, wout, 2), :]
            out = tap if out is None else jnp.maximum(out, tap)
    return out.reshape(hout * wout, c)


# ---------------------------------------------------------------------------
# Fused StemBlock kernel: one grid step == one image, all stages in VMEM.
# ---------------------------------------------------------------------------
def _stem_block_kernel(x_ref,
                       w0_ref, b0_ref,
                       w1_ref, b1_ref,
                       w2_ref, b2_ref,
                       wf_ref, bf_ref,
                       o_ref,
                       pad0_ref, padl_ref, padr_ref, padf_ref):
    H, W = x_ref.shape[1], x_ref.shape[2]
    H2, W2 = H // 2, W // 2
    H4, W4 = H // 4, W // 4

    # ---- halo-only initialization (interiors are overwritten below) --------
    _fill_halo(pad0_ref, 0.0)
    _fill_halo(padl_ref, 0.0)
    _fill_halo(padr_ref, -jnp.inf)   # maxpool padding semantics
    _fill_halo(padf_ref, 0.0)

    # ---- conv : ConvBNReLU(3 -> 16, 3x3, s=2, p=1) --------------------------
    pad0_ref[1:1 + H, 1:1 + W, :] = x_ref[0]
    f0 = _conv3x3_s2_relu(pad0_ref, w0_ref, b0_ref[...], H2, W2)   # (H2*W2, 16)

    # ---- left_1 : ConvBNReLU(16 -> 8, 1x1, p=0) -----------------------------
    l1 = jnp.maximum(
        jnp.dot(f0, w1_ref[...], preferred_element_type=jnp.float32) + b1_ref[...],
        0.0)                                                       # (H2*W2, 8)

    # ---- left_2 : ConvBNReLU(8 -> 16, 3x3, s=2, p=1) ------------------------
    padl_ref[1:1 + H2, 1:1 + W2, :] = l1.reshape(H2, W2, 8)
    l2 = _conv3x3_s2_relu(padl_ref, w2_ref, b2_ref[...], H4, W4)   # (H4*W4, 16)

    # ---- right : MaxPool2d(3, s=2, p=1) on f0 -------------------------------
    padr_ref[1:1 + H2, 1:1 + W2, :] = f0.reshape(H2, W2, 16)
    r = _maxpool3x3_s2(padr_ref, H4, W4)                           # (H4*W4, 16)

    # ---- fuse : ConvBNReLU(32 -> 16, 3x3, s=1, p=1) -------------------------
    # The channel concat is free: both halves are written into one 32-channel
    # padded scratch, then a single K=32 conv runs (9 dots instead of 18).
    padf_ref[1:1 + H4, 1:1 + W4, 0:16] = l2.reshape(H4, W4, 16)
    padf_ref[1:1 + H4, 1:1 + W4, 16:32] = r.reshape(H4, W4, 16)
    y = _conv3x3_s1_relu(padf_ref, wf_ref, bf_ref[...], H4, W4)    # (H4*W4, 16)

    o_ref[0] = y.reshape(H4, W4, 16).astype(o_ref.dtype)


# ---------------------------------------------------------------------------
# Wrapper
# ---------------------------------------------------------------------------
def _const_spec(shape):
    return pl.BlockSpec(shape, lambda n: (0,) * len(shape))


@jax.jit
def stem_block_forward(x_nchw, params):
    """StemBlock forward (eval, dataset=0). x: (N, 3, H, W) -> (N, 16, H/4, W/4)."""
    N, Cin, H, W = x_nchw.shape
    assert Cin == 3 and H % 4 == 0 and W % 4 == 0
    H2, W2, H4, W4 = H // 2, W // 2, H // 4, W // 4

    x = jnp.transpose(x_nchw, (0, 2, 3, 1)).astype(jnp.float32)   # NHWC

    # Fold the eval-BN + affine scale into the conv weights (per-Cout); the
    # remaining bias is passed separately and seeds the in-kernel accumulators.
    f32 = lambda a: a.astype(jnp.float32)
    w0 = f32(params["w0"] * params["scale0"])                      # (3,3,3,16)
    w1 = f32(params["w1"] * params["scale1"]).reshape(16, 8)       # (16,8)
    w2 = f32(params["w2"] * params["scale2"])                      # (3,3,8,16)
    wf = f32(params["wf"] * params["scalef"])                      # (3,3,32,16)
    b = lambda v: f32(v).reshape(1, -1)

    out_nhwc = pl.pallas_call(
        _stem_block_kernel,
        out_shape=jax.ShapeDtypeStruct((N, H4, W4, 16), jnp.float32),
        grid=(N,),
        in_specs=[
            pl.BlockSpec((1, H, W, Cin), lambda n: (n, 0, 0, 0)),
            _const_spec((3, 3, Cin, 16)), _const_spec((1, 16)),
            _const_spec((16, 8)),         _const_spec((1, 8)),
            _const_spec((3, 3, 8, 16)),   _const_spec((1, 16)),
            _const_spec((3, 3, 32, 16)),  _const_spec((1, 16)),
        ],
        out_specs=pl.BlockSpec((1, H4, W4, 16), lambda n: (n, 0, 0, 0)),
        scratch_shapes=[
            pltpu.VMEM((H + 2, W + 2, Cin), jnp.float32),    # padded input
            pltpu.VMEM((H2 + 2, W2 + 2, 8), jnp.float32),    # padded left_1
            pltpu.VMEM((H2 + 2, W2 + 2, 16), jnp.float32),   # -inf padded f0
            pltpu.VMEM((H4 + 2, W4 + 2, 32), jnp.float32),   # padded cat(l2, r)
        ],
        compiler_params=pltpu.CompilerParams(
            dimension_semantics=("parallel",)),
    )(x,
      w0, b(params["bias0"]),
      w1, b(params["bias1"]),
      w2, b(params["bias2"]),
      wf, b(params["biasf"]))

    return jnp.transpose(out_nhwc, (0, 3, 1, 2))              # NCHW


# ---------------------------------------------------------------------------
# Pure-JAX reference (eval-mode semantics), for in-script verification
# ---------------------------------------------------------------------------
def _stem_block_ref(x_nchw, params):
    x = jnp.transpose(x_nchw, (0, 2, 3, 1)).astype(jnp.float32)

    def cbr(t, w, scale, bias, stride, pad):
        y = jax.lax.conv_general_dilated(
            t, w, window_strides=(stride, stride),
            padding=((pad, pad), (pad, pad)),
            dimension_numbers=("NHWC", "HWIO", "NHWC"),
            precision=jax.lax.Precision.HIGHEST)
        return jnp.maximum(y * scale + bias, 0.0)

    f0 = cbr(x, params["w0"], params["scale0"], params["bias0"], 2, 1)
    l1 = cbr(f0, params["w1"], params["scale1"], params["bias1"], 1, 0)
    l2 = cbr(l1, params["w2"], params["scale2"], params["bias2"], 2, 1)
    r = jax.lax.reduce_window(f0, -jnp.inf, jax.lax.max,
                              (1, 3, 3, 1), (1, 2, 2, 1),
                              ((0, 0), (1, 1), (1, 1), (0, 0)))
    y = cbr(jnp.concatenate([l2, r], axis=-1),
            params["wf"], params["scalef"], params["biasf"], 1, 1)
    return jnp.transpose(y, (0, 3, 1, 2))


# ---------------------------------------------------------------------------
# Main
# ---------------------------------------------------------------------------
if __name__ == "__main__":
    N, Cin, H, W = 2, 3, 16, 16            # StemBlock fixes Cin = 3
    key = jax.random.PRNGKey(0)
    ks = jax.random.split(key, 13)
    eps = 1e-5
    inv_std = (1.0 + eps) ** -0.5          # eval BN: running mean=0, var=1

    def affine(kw, kb, c):
        aw = 1.0 + 0.1 * jax.random.normal(kw, (c,), jnp.float32)
        ab = 0.1 * jax.random.normal(kb, (c,), jnp.float32)
        return aw * inv_std, ab            # fused (scale, bias), mean = 0

    s0, b0 = affine(ks[1], ks[2], 16)
    s1, b1 = affine(ks[4], ks[5], 8)
    s2, b2 = affine(ks[7], ks[8], 16)
    sf, bf = affine(ks[10], ks[11], 16)
    params = {
        "w0": 0.1 * jax.random.normal(ks[0], (3, 3, 3, 16), jnp.float32),
        "scale0": s0, "bias0": b0,
        "w1": 0.1 * jax.random.normal(ks[3], (1, 1, 16, 8), jnp.float32),
        "scale1": s1, "bias1": b1,
        "w2": 0.1 * jax.random.normal(ks[6], (3, 3, 8, 16), jnp.float32),
        "scale2": s2, "bias2": b2,
        "wf": 0.1 * jax.random.normal(ks[9], (3, 3, 32, 16), jnp.float32),
        "scalef": sf, "biasf": bf,
    }
    x = jax.random.normal(ks[12], (N, Cin, H, W), jnp.float32)

    out = jax.block_until_ready(stem_block_forward(x, params))
    assert out.shape == (N, 16, H // 4, W // 4), out.shape
    assert bool(jnp.all(jnp.isfinite(out)))

    ref = jax.block_until_ready(_stem_block_ref(x, params))
    assert float(jnp.max(jnp.abs(out - ref))) < 3e-2

    print("KERNEL_OK")
</pallas_src>

<mosaic_0001>
module attributes {stable_mosaic.version = 11 : i64} {
  func.func @_stem_block_kernel(%arg0: i32, %arg1: memref<1x16x16x3xf32, #tpu.memory_space<vmem>>, %arg2: memref<3x3x3x16xf32, #tpu.memory_space<vmem>>, %arg3: memref<1x16xf32, #tpu.memory_space<vmem>>, %arg4: memref<16x8xf32, #tpu.memory_space<vmem>>, %arg5: memref<1x8xf32, #tpu.memory_space<vmem>>, %arg6: memref<3x3x8x16xf32, #tpu.memory_space<vmem>>, %arg7: memref<1x16xf32, #tpu.memory_space<vmem>>, %arg8: memref<3x3x32x16xf32, #tpu.memory_space<vmem>>, %arg9: memref<1x16xf32, #tpu.memory_space<vmem>>, %arg10: memref<1x4x4x16xf32, #tpu.memory_space<vmem>>, %arg11: memref<18x18x3xf32, #tpu.memory_space<vmem>>, %arg12: memref<10x10x8xf32, #tpu.memory_space<vmem>>, %arg13: memref<10x10x16xf32, #tpu.memory_space<vmem>>, %arg14: memref<6x6x32xf32, #tpu.memory_space<vmem>>) attributes {dimension_semantics = [#tpu.dimension_semantics<parallel>], iteration_bounds = array<i64: 2>, scalar_prefetch = 0 : i64, scratch_operands = 4 : i64, tpu.core_type = #tpu.core_type<tc>, window_params = [{transform_indices = @transform_0, window_bounds = array<i64: 1, 16, 16, 3>}, {pipeline_mode = #tpu.pipeline_mode<synchronous>, transform_indices = @transform_1, window_bounds = array<i64: 3, 3, 3, 16>}, {pipeline_mode = #tpu.pipeline_mode<synchronous>, transform_indices = @transform_2, window_bounds = array<i64: 1, 16>}, {pipeline_mode = #tpu.pipeline_mode<synchronous>, transform_indices = @transform_3, window_bounds = array<i64: 16, 8>}, {pipeline_mode = #tpu.pipeline_mode<synchronous>, transform_indices = @transform_4, window_bounds = array<i64: 1, 8>}, {pipeline_mode = #tpu.pipeline_mode<synchronous>, transform_indices = @transform_5, window_bounds = array<i64: 3, 3, 8, 16>}, {pipeline_mode = #tpu.pipeline_mode<synchronous>, transform_indices = @transform_6, window_bounds = array<i64: 1, 16>}, {pipeline_mode = #tpu.pipeline_mode<synchronous>, transform_indices = @transform_7, window_bounds = array<i64: 3, 3, 32, 16>}, {pipeline_mode = #tpu.pipeline_mode<synchronous>, transform_indices = @transform_8, window_bounds = array<i64: 1, 16>}, {transform_indices = @transform_9, window_bounds = array<i64: 1, 4, 4, 16>}]} {
    %cst = arith.constant 0.000000e+00 : f32
    %0 = vector.broadcast %cst : f32 to vector<1x18x3xf32>
    %c0 = arith.constant 0 : index
    %c0_0 = arith.constant 0 : index
    %c0_1 = arith.constant 0 : index
    %1 = vector.load %arg11[%c0, %c0_0, %c0_1] : memref<18x18x3xf32, #tpu.memory_space<vmem>>, vector<1x18x3xf32>
    tpu.vector_store %arg11[%c0, %c0_0, %c0_1], %0 {strides = array<i32>} : memref<18x18x3xf32, #tpu.memory_space<vmem>>, vector<1x18x3xf32>,
    %cst_2 = arith.constant 0.000000e+00 : f32
    %2 = vector.broadcast %cst_2 : f32 to vector<1x18x3xf32>
    %c17 = arith.constant 17 : index
    %c0_3 = arith.constant 0 : index
    %c0_4 = arith.constant 0 : index
    %3 = vector.load %arg11[%c17, %c0_3, %c0_4] : memref<18x18x3xf32, #tpu.memory_space<vmem>>, vector<1x18x3xf32>
    tpu.vector_store %arg11[%c17, %c0_3, %c0_4], %2 {strides = array<i32>} : memref<18x18x3xf32, #tpu.memory_space<vmem>>, vector<1x18x3xf32>,
    %cst_5 = arith.constant 0.000000e+00 : f32
    %4 = vector.broadcast %cst_5 : f32 to vector<18x1x3xf32>
    %c0_6 = arith.constant 0 : index
    %c0_7 = arith.constant 0 : index
    %c0_8 = arith.constant 0 : index
    %5 = vector.load %arg11[%c0_6, %c0_7, %c0_8] : memref<18x18x3xf32, #tpu.memory_space<vmem>>, vector<18x1x3xf32>
    tpu.vector_store %arg11[%c0_6, %c0_7, %c0_8], %4 {strides = array<i32>} : memref<18x18x3xf32, #tpu.memory_space<vmem>>, vector<18x1x3xf32>,
    %cst_9 = arith.constant 0.000000e+00 : f32
    %6 = vector.broadcast %cst_9 : f32 to vector<18x1x3xf32>
    %c0_10 = arith.constant 0 : index
    %c17_11 = arith.constant 17 : index
    %c0_12 = arith.constant 0 : index
    %7 = vector.load %arg11[%c0_10, %c17_11, %c0_12] : memref<18x18x3xf32, #tpu.memory_space<vmem>>, vector<18x1x3xf32>
    tpu.vector_store %arg11[%c0_10, %c17_11, %c0_12], %6 {strides = array<i32>} : memref<18x18x3xf32, #tpu.memory_space<vmem>>, vector<18x1x3xf32>,
    %cst_13 = arith.constant 0.000000e+00 : f32
    %8 = vector.broadcast %cst_13 : f32 to vector<1x10x8xf32>
    %c0_14 = arith.constant 0 : index
    %c0_15 = arith.constant 0 : index
    %c0_16 = arith.constant 0 : index
    %9 = vector.load %arg12[%c0_14, %c0_15, %c0_16] : memref<10x10x8xf32, #tpu.memory_space<vmem>>, vector<1x10x8xf32>
    tpu.vector_store %arg12[%c0_14, %c0_15, %c0_16], %8 {strides = array<i32>} : memref<10x10x8xf32, #tpu.memory_space<vmem>>, vector<1x10x8xf32>,
    %cst_17 = arith.constant 0.000000e+00 : f32
    %10 = vector.broadcast %cst_17 : f32 to vector<1x10x8xf32>
    %c9 = arith.constant 9 : index
    %c0_18 = arith.constant 0 : index
    %c0_19 = arith.constant 0 : index
    %11 = vector.load %arg12[%c9, %c0_18, %c0_19] : memref<10x10x8xf32, #tpu.memory_space<vmem>>, vector<1x10x8xf32>
    tpu.vector_store %arg12[%c9, %c0_18, %c0_19], %10 {strides = array<i32>} : memref<10x10x8xf32, #tpu.memory_space<vmem>>, vector<1x10x8xf32>,
    %cst_20 = arith.constant 0.000000e+00 : f32
    %12 = vector.broadcast %cst_20 : f32 to vector<10x1x8xf32>
    %c0_21 = arith.constant 0 : index
    %c0_22 = arith.constant 0 : index
    %c0_23 = arith.constant 0 : index
    %13 = vector.load %arg12[%c0_21, %c0_22, %c0_23] : memref<10x10x8xf32, #tpu.memory_space<vmem>>, vector<10x1x8xf32>
    tpu.vector_store %arg12[%c0_21, %c0_22, %c0_23], %12 {strides = array<i32>} : memref<10x10x8xf32, #tpu.memory_space<vmem>>, vector<10x1x8xf32>,
    %cst_24 = arith.constant 0.000000e+00 : f32
    %14 = vector.broadcast %cst_24 : f32 to vector<10x1x8xf32>
    %c0_25 = arith.constant 0 : index
    %c9_26 = arith.constant 9 : index
    %c0_27 = arith.constant 0 : index
    %15 = vector.load %arg12[%c0_25, %c9_26, %c0_27] : memref<10x10x8xf32, #tpu.memory_space<vmem>>, vector<10x1x8xf32>
    tpu.vector_store %arg12[%c0_25, %c9_26, %c0_27], %14 {strides = array<i32>} : memref<10x10x8xf32, #tpu.memory_space<vmem>>, vector<10x1x8xf32>,
    %cst_28 = arith.constant 0xFF800000 : f32
    %16 = vector.broadcast %cst_28 : f32 to vector<1x10x16xf32>
    %c0_29 = arith.constant 0 : index
    %c0_30 = arith.constant 0 : index
    %c0_31 = arith.constant 0 : index
    %17 = vector.load %arg13[%c0_29, %c0_30, %c0_31] : memref<10x10x16xf32, #tpu.memory_space<vmem>>, vector<1x10x16xf32>
    tpu.vector_store %arg13[%c0_29, %c0_30, %c0_31], %16 {strides = array<i32>} : memref<10x10x16xf32, #tpu.memory_space<vmem>>, vector<1x10x16xf32>,
    %cst_32 = arith.constant 0xFF800000 : f32
    %18 = vector.broadcast %cst_32 : f32 to vector<1x10x16xf32>
    %c9_33 = arith.constant 9 : index
    %c0_34 = arith.constant 0 : index
    %c0_35 = arith.constant 0 : index
    %19 = vector.load %arg13[%c9_33, %c0_34, %c0_35] : memref<10x10x16xf32, #tpu.memory_space<vmem>>, vector<1x10x16xf32>
    tpu.vector_store %arg13[%c9_33, %c0_34, %c0_35], %18 {strides = array<i32>} : memref<10x10x16xf32, #tpu.memory_space<vmem>>, vector<1x10x16xf32>,
    %cst_36 = arith.constant 0xFF800000 : f32
    %20 = vector.broadcast %cst_36 : f32 to vector<10x1x16xf32>
    %c0_37 = arith.constant 0 : index
    %c0_38 = arith.constant 0 : index
    %c0_39 = arith.constant 0 : index
    %21 = vector.load %arg13[%c0_37, %c0_38, %c0_39] : memref<10x10x16xf32, #tpu.memory_space<vmem>>, vector<10x1x16xf32>
    tpu.vector_store %arg13[%c0_37, %c0_38, %c0_39], %20 {strides = array<i32>} : memref<10x10x16xf32, #tpu.memory_space<vmem>>, vector<10x1x16xf32>,
    %cst_40 = arith.constant 0xFF800000 : f32
    %22 = vector.broadcast %cst_40 : f32 to vector<10x1x16xf32>
    %c0_41 = arith.constant 0 : index
    %c9_42 = arith.constant 9 : index
    %c0_43 = arith.constant 0 : index
    %23 = vector.load %arg13[%c0_41, %c9_42, %c0_43] : memref<10x10x16xf32, #tpu.memory_space<vmem>>, vector<10x1x16xf32>
    tpu.vector_store %arg13[%c0_41, %c9_42, %c0_43], %22 {strides = array<i32>} : memref<10x10x16xf32, #tpu.memory_space<vmem>>, vector<10x1x16xf32>,
    %cst_44 = arith.constant 0.000000e+00 : f32
    %24 = vector.broadcast %cst_44 : f32 to vector<1x6x32xf32>
    %c0_45 = arith.constant 0 : index
    %c0_46 = arith.constant 0 : index
    %c0_47 = arith.constant 0 : index
    %25 = vector.load %arg14[%c0_45, %c0_46, %c0_47] : memref<6x6x32xf32, #tpu.memory_space<vmem>>, vector<1x6x32xf32>
    tpu.vector_store %arg14[%c0_45, %c0_46, %c0_47], %24 {strides = array<i32>} : memref<6x6x32xf32, #tpu.memory_space<vmem>>, vector<1x6x32xf32>,
    %cst_48 = arith.constant 0.000000e+00 : f32
    %26 = vector.broadcast %cst_48 : f32 to vector<1x6x32xf32>
    %c5 = arith.constant 5 : index
    %c0_49 = arith.constant 0 : index
    %c0_50 = arith.constant 0 : index
    %27 = vector.load %arg14[%c5, %c0_49, %c0_50] : memref<6x6x32xf32, #tpu.memory_space<vmem>>, vector<1x6x32xf32>
    tpu.vector_store %arg14[%c5, %c0_49, %c0_50], %26 {strides = array<i32>} : memref<6x6x32xf32, #tpu.memory_space<vmem>>, vector<1x6x32xf32>,
    %cst_51 = arith.constant 0.000000e+00 : f32
    %28 = vector.broadcast %cst_51 : f32 to vector<6x1x32xf32>
    %c0_52 = arith.constant 0 : index
    %c0_53 = arith.constant 0 : index
    %c0_54 = arith.constant 0 : index
    %29 = vector.load %arg14[%c0_52, %c0_53, %c0_54] : memref<6x6x32xf32, #tpu.memory_space<vmem>>, vector<6x1x32xf32>
    tpu.vector_store %arg14[%c0_52, %c0_53, %c0_54], %28 {strides = array<i32>} : memref<6x6x32xf32, #tpu.memory_space<vmem>>, vector<6x1x32xf32>,
    %cst_55 = arith.constant 0.000000e+00 : f32
    %30 = vector.broadcast %cst_55 : f32 to vector<6x1x32xf32>
    %c0_56 = arith.constant 0 : index
    %c5_57 = arith.constant 5 : index
    %c0_58 = arith.constant 0 : index
    %31 = vector.load %arg14[%c0_56, %c5_57, %c0_58] : memref<6x6x32xf32, #tpu.memory_space<vmem>>, vector<6x1x32xf32>
    tpu.vector_store %arg14[%c0_56, %c5_57, %c0_58], %30 {strides = array<i32>} : memref<6x6x32xf32, #tpu.memory_space<vmem>>, vector<6x1x32xf32>,
    %c0_59 = arith.constant 0 : index
    %c0_60 = arith.constant 0 : index
    %c0_61 = arith.constant 0 : index
    %c0_62 = arith.constant 0 : index
    %32 = vector.load %arg1[%c0_59, %c0_60, %c0_61, %c0_62] : memref<1x16x16x3xf32, #tpu.memory_space<vmem>>, vector<1x16x16x3xf32>
    %33 = vector.shape_cast %32 : vector<1x16x16x3xf32> to vector<16x16x3xf32>
    %c1 = arith.constant 1 : index
    %c1_63 = arith.constant 1 : index
    %c0_64 = arith.constant 0 : index
    %34 = vector.load %arg11[%c1, %c1_63, %c0_64] : memref<18x18x3xf32, #tpu.memory_space<vmem>>, vector<16x16x3xf32>
    tpu.vector_store %arg11[%c1, %c1_63, %c0_64], %33 {strides = array<i32>} : memref<18x18x3xf32, #tpu.memory_space<vmem>>, vector<16x16x3xf32>,
    %c0_65 = arith.constant 0 : index
    %c0_66 = arith.constant 0 : index
    %35 = vector.load %arg3[%c0_65, %c0_66] : memref<1x16xf32, #tpu.memory_space<vmem>>, vector<1x16xf32>
    %c0_67 = arith.constant 0 : index
    %c0_68 = arith.constant 0 : index
    %c0_69 = arith.constant 0 : index
    %36 = tpu.strided_load %arg11[%c0_67, %c0_68, %c0_69] {strides = array<i32: 2, 2, 1>} : memref<18x18x3xf32, #tpu.memory_space<vmem>>, vector<8x8x3xf32>
    %37 = vector.shape_cast %36 : vector<8x8x3xf32> to vector<64x3xf32>
    %c0_70 = arith.constant 0 : index
    %c0_71 = arith.constant 0 : index
    %c0_72 = arith.constant 0 : index
    %c0_73 = arith.constant 0 : index
    %38 = vector.load %arg2[%c0_70, %c0_71, %c0_72, %c0_73] : memref<3x3x3x16xf32, #tpu.memory_space<vmem>>, vector<1x1x3x16xf32>
    %39 = vector.shape_cast %38 : vector<1x1x3x16xf32> to vector<3x16xf32>
    %cst_74 = arith.constant dense<0.000000e+00> : vector<64x16xf32>
    %40 = tpu.matmul %37, %39, %cst_74 {dimension_numbers = #tpu.dot_dimension_numbers<[1], [0], [0], [1], [0, 0, 1, 1], [], []>} : vector<64x3xf32>, vector<3x16xf32>, vector<64x16xf32> -> vector<64x16xf32>
    %41 = vector.broadcast %35 : vector<1x16xf32> to vector<64x16xf32>
    %42 = arith.addf %40, %41 : vector<64x16xf32>
    %c0_75 = arith.constant 0 : index
    %c1_76 = arith.constant 1 : index
    %c0_77 = arith.constant 0 : index
    %43 = tpu.strided_load %arg11[%c0_75, %c1_76, %c0_77] {strides = array<i32: 2, 2, 1>} : memref<18x18x3xf32, #tpu.memory_space<vmem>>, vector<8x8x3xf32>
    %44 = vector.shape_cast %43 : vector<8x8x3xf32> to vector<64x3xf32>
    %c0_78 = arith.constant 0 : index
    %c1_79 = arith.constant 1 : index
    %c0_80 = arith.constant 0 : index
    %c0_81 = arith.constant 0 : index
    %45 = vector.load %arg2[%c0_78, %c1_79, %c0_80, %c0_81] : memref<3x3x3x16xf32, #tpu.memory_space<vmem>>, vector<1x1x3x16xf32>
    %46 = vector.shape_cast %45 : vector<1x1x3x16xf32> to vector<3x16xf32>
    %cst_82 = arith.constant dense<0.000000e+00> : vector<64x16xf32>
    %47 = tpu.matmul %44, %46, %cst_82 {dimension_numbers = #tpu.dot_dimension_numbers<[1], [0], [0], [1], [0, 0, 1, 1], [], []>} : vector<64x3xf32>, vector<3x16xf32>, vector<64x16xf32> -> vector<64x16xf32>
    %48 = arith.addf %42, %47 : vector<64x16xf32>
    %c0_83 = arith.constant 0 : index
    %c2 = arith.constant 2 : index
    %c0_84 = arith.constant 0 : index
    %49 = tpu.strided_load %arg11[%c0_83, %c2, %c0_84] {strides = array<i32: 2, 2, 1>} : memref<18x18x3xf32, #tpu.memory_space<vmem>>, vector<8x8x3xf32>
    %50 = vector.shape_cast %49 : vector<8x8x3xf32> to vector<64x3xf32>
    %c0_85 = arith.constant 0 : index
    %c2_86 = arith.constant 2 : index
    %c0_87 = arith.constant 0 : index
    %c0_88 = arith.constant 0 : index
    %51 = vector.load %arg2[%c0_85, %c2_86, %c0_87, %c0_88] : memref<3x3x3x16xf32, #tpu.memory_space<vmem>>, vector<1x1x3x16xf32>
    %52 = vector.shape_cast %51 : vector<1x1x3x16xf32> to vector<3x16xf32>
    %cst_89 = arith.constant dense<0.000000e+00> : vector<64x16xf32>
    %53 = tpu.matmul %50, %52, %cst_89 {dimension_numbers = #tpu.dot_dimension_numbers<[1], [0], [0], [1], [0, 0, 1, 1], [], []>} : vector<64x3xf32>, vector<3x16xf32>, vector<64x16xf32> -> vector<64x16xf32>
    %54 = arith.addf %48, %53 : vector<64x16xf32>
    %c1_90 = arith.constant 1 : index
    %c0_91 = arith.constant 0 : index
    %c0_92 = arith.constant 0 : index
    %55 = tpu.strided_load %arg11[%c1_90, %c0_91, %c0_92] {strides = array<i32: 2, 2, 1>} : memref<18x18x3xf32, #tpu.memory_space<vmem>>, vector<8x8x3xf32>
    %56 = vector.shape_cast %55 : vector<8x8x3xf32> to vector<64x3xf32>
    %c1_93 = arith.constant 1 : index
    %c0_94 = arith.constant 0 : index
    %c0_95 = arith.constant 0 : index
    %c0_96 = arith.constant 0 : index
    %57 = vector.load %arg2[%c1_93, %c0_94, %c0_95, %c0_96] : memref<3x3x3x16xf32, #tpu.memory_space<vmem>>, vector<1x1x3x16xf32>
    %58 = vector.shape_cast %57 : vector<1x1x3x16xf32> to vector<3x16xf32>
    %cst_97 = arith.constant dense<0.000000e+00> : vector<64x16xf32>
    %59 = tpu.matmul %56, %58, %cst_97 {dimension_numbers = #tpu.dot_dimension_numbers<[1], [0], [0], [1], [0, 0, 1, 1], [], []>} : vector<64x3xf32>, vector<3x16xf32>, vector<64x16xf32> -> vector<64x16xf32>
    %60 = arith.addf %54, %59 : vector<64x16xf32>
    %c1_98 = arith.constant 1 : index
    %c1_99 = arith.constant 1 : index
    %c0_100 = arith.constant 0 : index
    %61 = tpu.strided_load %arg11[%c1_98, %c1_99, %c0_100] {strides = array<i32: 2, 2, 1>} : memref<18x18x3xf32, #tpu.memory_space<vmem>>, vector<8x8x3xf32>
    %62 = vector.shape_cast %61 : vector<8x8x3xf32> to vector<64x3xf32>
    %c1_101 = arith.constant 1 : index
    %c1_102 = arith.constant 1 : index
    %c0_103 = arith.constant 0 : index
    %c0_104 = arith.constant 0 : index
    %63 = vector.load %arg2[%c1_101, %c1_102, %c0_103, %c0_104] : memref<3x3x3x16xf32, #tpu.memory_space<vmem>>, vector<1x1x3x16xf32>
    %64 = vector.shape_cast %63 : vector<1x1x3x16xf32> to vector<3x16xf32>
    %cst_105 = arith.constant dense<0.000000e+00> : vector<64x16xf32>
    %65 = tpu.matmul %62, %64, %cst_105 {dimension_numbers = #tpu.dot_dimension_numbers<[1], [0], [0], [1], [0, 0, 1, 1], [], []>} : vector<64x3xf32>, vector<3x16xf32>, vector<64x16xf32> -> vector<64x16xf32>
    %66 = arith.addf %60, %65 : vector<64x16xf32>
    %c1_106 = arith.constant 1 : index
    %c2_107 = arith.constant 2 : index
    %c0_108 = arith.constant 0 : index
    %67 = tpu.strided_load %arg11[%c1_106, %c2_107, %c0_108] {strides = array<i32: 2, 2, 1>} : memref<18x18x3xf32, #tpu.memory_space<vmem>>, vector<8x8x3xf32>
    %68 = vector.shape_cast %67 : vector<8x8x3xf32> to vector<64x3xf32>
    %c1_109 = arith.constant 1 : index
    %c2_110 = arith.constant 2 : index
    %c0_111 = arith.constant 0 : index
    %c0_112 = arith.constant 0 : index
    %69 = vector.load %arg2[%c1_109, %c2_110, %c0_111, %c0_112] : memref<3x3x3x16xf32, #tpu.memory_space<vmem>>, vector<1x1x3x16xf32>
    %70 = vector.shape_cast %69 : vector<1x1x3x16xf32> to vector<3x16xf32>
    %cst_113 = arith.constant dense<0.000000e+00> : vector<64x16xf32>
    %71 = tpu.matmul %68, %70, %cst_113 {dimension_numbers = #tpu.dot_dimension_numbers<[1], [0], [0], [1], [0, 0, 1, 1], [], []>} : vector<64x3xf32>, vector<3x16xf32>, vector<64x16xf32> -> vector<64x16xf32>
    %72 = arith.addf %66, %71 : vector<64x16xf32>
    %c2_114 = arith.constant 2 : index
    %c0_115 = arith.constant 0 : index
    %c0_116 = arith.constant 0 : index
    %73 = tpu.strided_load %arg11[%c2_114, %c0_115, %c0_116] {strides = array<i32: 2, 2, 1>} : memref<18x18x3xf32, #tpu.memory_space<vmem>>, vector<8x8x3xf32>
    %74 = vector.shape_cast %73 : vector<8x8x3xf32> to vector<64x3xf32>
    %c2_117 = arith.constant 2 : index
    %c0_118 = arith.constant 0 : index
    %c0_119 = arith.constant 0 : index
    %c0_120 = arith.constant 0 : index
    %75 = vector.load %arg2[%c2_117, %c0_118, %c0_119, %c0_120] : memref<3x3x3x16xf32, #tpu.memory_space<vmem>>, vector<1x1x3x16xf32>
    %76 = vector.shape_cast %75 : vector<1x1x3x16xf32> to vector<3x16xf32>
    %cst_121 = arith.constant dense<0.000000e+00> : vector<64x16xf32>
    %77 = tpu.matmul %74, %76, %cst_121 {dimension_numbers = #tpu.dot_dimension_numbers<[1], [0], [0], [1], [0, 0, 1, 1], [], []>} : vector<64x3xf32>, vector<3x16xf32>, vector<64x16xf32> -> vector<64x16xf32>
    %78 = arith.addf %72, %77 : vector<64x16xf32>
    %c2_122 = arith.constant 2 : index
    %c1_123 = arith.constant 1 : index
    %c0_124 = arith.constant 0 : index
    %79 = tpu.strided_load %arg11[%c2_122, %c1_123, %c0_124] {strides = array<i32: 2, 2, 1>} : memref<18x18x3xf32, #tpu.memory_space<vmem>>, vector<8x8x3xf32>
    %80 = vector.shape_cast %79 : vector<8x8x3xf32> to vector<64x3xf32>
    %c2_125 = arith.constant 2 : index
    %c1_126 = arith.constant 1 : index
    %c0_127 = arith.constant 0 : index
    %c0_128 = arith.constant 0 : index
    %81 = vector.load %arg2[%c2_125, %c1_126, %c0_127, %c0_128] : memref<3x3x3x16xf32, #tpu.memory_space<vmem>>, vector<1x1x3x16xf32>
    %82 = vector.shape_cast %81 : vector<1x1x3x16xf32> to vector<3x16xf32>
    %cst_129 = arith.constant dense<0.000000e+00> : vector<64x16xf32>
    %83 = tpu.matmul %80, %82, %cst_129 {dimension_numbers = #tpu.dot_dimension_numbers<[1], [0], [0], [1], [0, 0, 1, 1], [], []>} : vector<64x3xf32>, vector<3x16xf32>, vector<64x16xf32> -> vector<64x16xf32>
    %84 = arith.addf %78, %83 : vector<64x16xf32>
    %c2_130 = arith.constant 2 : index
    %c2_131 = arith.constant 2 : index
    %c0_132 = arith.constant 0 : index
    %85 = tpu.strided_load %arg11[%c2_130, %c2_131, %c0_132] {strides = array<i32: 2, 2, 1>} : memref<18x18x3xf32, #tpu.memory_space<vmem>>, vector<8x8x3xf32>
    %86 = vector.shape_cast %85 : vector<8x8x3xf32> to vector<64x3xf32>
    %c2_133 = arith.constant 2 : index
    %c2_134 = arith.constant 2 : index
    %c0_135 = arith.constant 0 : index
    %c0_136 = arith.constant 0 : index
    %87 = vector.load %arg2[%c2_133, %c2_134, %c0_135, %c0_136] : memref<3x3x3x16xf32, #tpu.memory_space<vmem>>, vector<1x1x3x16xf32>
    %88 = vector.shape_cast %87 : vector<1x1x3x16xf32> to vector<3x16xf32>
    %cst_137 = arith.constant dense<0.000000e+00> : vector<64x16xf32>
    %89 = tpu.matmul %86, %88, %cst_137 {dimension_numbers = #tpu.dot_dimension_numbers<[1], [0], [0], [1], [0, 0, 1, 1], [], []>} : vector<64x3xf32>, vector<3x16xf32>, vector<64x16xf32> -> vector<64x16xf32>
    %90 = arith.addf %84, %89 : vector<64x16xf32>
    %cst_138 = arith.constant 0.000000e+00 : f32
    %91 = vector.broadcast %cst_138 : f32 to vector<64x16xf32>
    %92 = arith.maximumf %90, %91 : vector<64x16xf32>
    %c0_139 = arith.constant 0 : index
    %c0_140 = arith.constant 0 : index
    %93 = vector.load %arg4[%c0_139, %c0_140] : memref<16x8xf32, #tpu.memory_space<vmem>>, vector<16x8xf32>
    %cst_141 = arith.constant dense<0.000000e+00> : vector<64x8xf32>
    %94 = tpu.matmul %92, %93, %cst_141 {dimension_numbers = #tpu.dot_dimension_numbers<[1], [0], [0], [1], [0, 0, 1, 1], [], []>} : vector<64x16xf32>, vector<16x8xf32>, vector<64x8xf32> -> vector<64x8xf32>
    %c0_142 = arith.constant 0 : index
    %c0_143 = arith.constant 0 : index
    %95 = vector.load %arg5[%c0_142, %c0_143] : memref<1x8xf32, #tpu.memory_space<vmem>>, vector<1x8xf32>
    %96 = vector.broadcast %95 : vector<1x8xf32> to vector<64x8xf32>
    %97 = arith.addf %94, %96 : vector<64x8xf32>
    %cst_144 = arith.constant 0.000000e+00 : f32
    %98 = vector.broadcast %cst_144 : f32 to vector<64x8xf32>
    %99 = arith.maximumf %97, %98 : vector<64x8xf32>
    %100 = vector.shape_cast %99 : vector<64x8xf32> to vector<8x8x8xf32>
    %c1_145 = arith.constant 1 : index
    %c1_146 = arith.constant 1 : index
    %c0_147 = arith.constant 0 : index
    %101 = vector.load %arg12[%c1_145, %c1_146, %c0_147] : memref<10x10x8xf32, #tpu.memory_space<vmem>>, vector<8x8x8xf32>
    tpu.vector_store %arg12[%c1_145, %c1_146, %c0_147], %100 {strides = array<i32>} : memref<10x10x8xf32, #tpu.memory_space<vmem>>, vector<8x8x8xf32>,
    %c0_148 = arith.constant 0 : index
    %c0_149 = arith.constant 0 : index
    %102 = vector.load %arg7[%c0_148, %c0_149] : memref<1x16xf32, #tpu.memory_space<vmem>>, vector<1x16xf32>
    %c0_150 = arith.constant 0 : index
    %c0_151 = arith.constant 0 : index
    %c0_152 = arith.constant 0 : index
    %103 = tpu.strided_load %arg12[%c0_150, %c0_151, %c0_152] {strides = array<i32: 2, 2, 1>} : memref<10x10x8xf32, #tpu.memory_space<vmem>>, vector<4x4x8xf32>
    %104 = vector.shape_cast %103 : vector<4x4x8xf32> to vector<16x8xf32>
    %c0_153 = arith.constant 0 : index
    %c0_154 = arith.constant 0 : index
    %c0_155 = arith.constant 0 : index
    %c0_156 = arith.constant 0 : index
    %105 = vector.load %arg6[%c0_153, %c0_154, %c0_155, %c0_156] : memref<3x3x8x16xf32, #tpu.memory_space<vmem>>, vector<1x1x8x16xf32>
    %106 = vector.shape_cast %105 : vector<1x1x8x16xf32> to vector<8x16xf32>
    %cst_157 = arith.constant dense<0.000000e+00> : vector<16x16xf32>
    %107 = tpu.matmul %104, %106, %cst_157 {dimension_numbers = #tpu.dot_dimension_numbers<[1], [0], [0], [1], [0, 0, 1, 1], [], []>} : vector<16x8xf32>, vector<8x16xf32>, vector<16x16xf32> -> vector<16x16xf32>
    %108 = vector.broadcast %102 : vector<1x16xf32> to vector<16x16xf32>
    %109 = arith.addf %107, %108 : vector<16x16xf32>
    %c0_158 = arith.constant 0 : index
    %c1_159 = arith.constant 1 : index
    %c0_160 = arith.constant 0 : index
    %110 = tpu.strided_load %arg12[%c0_158, %c1_159, %c0_160] {strides = array<i32: 2, 2, 1>} : memref<10x10x8xf32, #tpu.memory_space<vmem>>, vector<4x4x8xf32>
    %111 = vector.shape_cast %110 : vector<4x4x8xf32> to vector<16x8xf32>
    %c0_161 = arith.constant 0 : index
    %c1_162 = arith.constant 1 : index
    %c0_163 = arith.constant 0 : index
    %c0_164 = arith.constant 0 : index
    %112 = vector.load %arg6[%c0_161, %c1_162, %c0_163, %c0_164] : memref<3x3x8x16xf32, #tpu.memory_space<vmem>>, vector<1x1x8x16xf32>
    %113 = vector.shape_cast %112 : vector<1x1x8x16xf32> to vector<8x16xf32>
    %cst_165 = arith.constant dense<0.000000e+00> : vector<16x16xf32>
    %114 = tpu.matmul %111, %113, %cst_165 {dimension_numbers = #tpu.dot_dimension_numbers<[1], [0], [0], [1], [0, 0, 1, 1], [], []>} : vector<16x8xf32>, vector<8x16xf32>, vector<16x16xf32> -> vector<16x16xf32>
    %115 = arith.addf %109, %114 : vector<16x16xf32>
    %c0_166 = arith.constant 0 : index
    %c2_167 = arith.constant 2 : index
    %c0_168 = arith.constant 0 : index
    %116 = tpu.strided_load %arg12[%c0_166, %c2_167, %c0_168] {strides = array<i32: 2, 2, 1>} : memref<10x10x8xf32, #tpu.memory_space<vmem>>, vector<4x4x8xf32>
    %117 = vector.shape_cast %116 : vector<4x4x8xf32> to vector<16x8xf32>
    %c0_169 = arith.constant 0 : index
    %c2_170 = arith.constant 2 : index
    %c0_171 = arith.constant 0 : index
    %c0_172 = arith.constant 0 : index
    %118 = vector.load %arg6[%c0_169, %c2_170, %c0_171, %c0_172] : memref<3x3x8x16xf32, #tpu.memory_space<vmem>>, vector<1x1x8x16xf32>
    %119 = vector.shape_cast %118 : vector<1x1x8x16xf32> to vector<8x16xf32>
    %cst_173 = arith.constant dense<0.000000e+00> : vector<16x16xf32>
    %120 = tpu.matmul %117, %119, %cst_173 {dimension_numbers = #tpu.dot_dimension_numbers<[1], [0], [0], [1], [0, 0, 1, 1], [], []>} : vector<16x8xf32>, vector<8x16xf32>, vector<16x16xf32> -> vector<16x16xf32>
    %121 = arith.addf %115, %120 : vector<16x16xf32>
    %c1_174 = arith.constant 1 : index
    %c0_175 = arith.constant 0 : index
    %c0_176 = arith.constant 0 : index
    %122 = tpu.strided_load %arg12[%c1_174, %c0_175, %c0_176] {strides = array<i32: 2, 2, 1>} : memref<10x10x8xf32, #tpu.memory_space<vmem>>, vector<4x4x8xf32>
    %123 = vector.shape_cast %122 : vector<4x4x8xf32> to vector<16x8xf32>
    %c1_177 = arith.constant 1 : index
    %c0_178 = arith.constant 0 : index
    %c0_179 = arith.constant 0 : index
    %c0_180 = arith.constant 0 : index
    %124 = vector.load %arg6[%c1_177, %c0_178, %c0_179, %c0_180] : memref<3x3x8x16xf32, #tpu.memory_space<vmem>>, vector<1x1x8x16xf32>
    %125 = vector.shape_cast %124 : vector<1x1x8x16xf32> to vector<8x16xf32>
    %cst_181 = arith.constant dense<0.000000e+00> : vector<16x16xf32>
    %126 = tpu.matmul %123, %125, %cst_181 {dimension_numbers = #tpu.dot_dimension_numbers<[1], [0], [0], [1], [0, 0, 1, 1], [], []>} : vector<16x8xf32>, vector<8x16xf32>, vector<16x16xf32> -> vector<16x16xf32>
    %127 = arith.addf %121, %126 : vector<16x16xf32>
    %c1_182 = arith.constant 1 : index
    %c1_183 = arith.constant 1 : index
    %c0_184 = arith.constant 0 : index
    %128 = tpu.strided_load %arg12[%c1_182, %c1_183, %c0_184] {strides = array<i32: 2, 2, 1>} : memref<10x10x8xf32, #tpu.memory_space<vmem>>, vector<4x4x8xf32>
    %129 = vector.shape_cast %128 : vector<4x4x8xf32> to vector<16x8xf32>
    %c1_185 = arith.constant 1 : index
    %c1_186 = arith.constant 1 : index
    %c0_187 = arith.constant 0 : index
    %c0_188 = arith.constant 0 : index
    %130 = vector.load %arg6[%c1_185, %c1_186, %c0_187, %c0_188] : memref<3x3x8x16xf32, #tpu.memory_space<vmem>>, vector<1x1x8x16xf32>
    %131 = vector.shape_cast %130 : vector<1x1x8x16xf32> to vector<8x16xf32>
    %cst_189 = arith.constant dense<0.000000e+00> : vector<16x16xf32>
    %132 = tpu.matmul %129, %131, %cst_189 {dimension_numbers = #tpu.dot_dimension_numbers<[1], [0], [0], [1], [0, 0, 1, 1], [], []>} : vector<16x8xf32>, vector<8x16xf32>, vector<16x16xf32> -> vector<16x16xf32>
    %133 = arith.addf %127, %132 : vector<16x16xf32>
    %c1_190 = arith.constant 1 : index
    %c2_191 = arith.constant 2 : index
    %c0_192 = arith.constant 0 : index
    %134 = tpu.strided_load %arg12[%c1_190, %c2_191, %c0_192] {strides = array<i32: 2, 2, 1>} : memref<10x10x8xf32, #tpu.memory_space<vmem>>, vector<4x4x8xf32>
    %135 = vector.shape_cast %134 : vector<4x4x8xf32> to vector<16x8xf32>
    %c1_193 = arith.constant 1 : index
    %c2_194 = arith.constant 2 : index
    %c0_195 = arith.constant 0 : index
    %c0_196 = arith.constant 0 : index
    %136 = vector.load %arg6[%c1_193, %c2_194, %c0_195, %c0_196] : memref<3x3x8x16xf32, #tpu.memory_space<vmem>>, vector<1x1x8x16xf32>
    %137 = vector.shape_cast %136 : vector<1x1x8x16xf32> to vector<8x16xf32>
    %cst_197 = arith.constant dense<0.000000e+00> : vector<16x16xf32>
    %138 = tpu.matmul %135, %137, %cst_197 {dimension_numbers = #tpu.dot_dimension_numbers<[1], [0], [0], [1], [0, 0, 1, 1], [], []>} : vector<16x8xf32>, vector<8x16xf32>, vector<16x16xf32> -> vector<16x16xf32>
    %139 = arith.addf %133, %138 : vector<16x16xf32>
    %c2_198 = arith.constant 2 : index
    %c0_199 = arith.constant 0 : index
    %c0_200 = arith.constant 0 : index
    %140 = tpu.strided_load %arg12[%c2_198, %c0_199, %c0_200] {strides = array<i32: 2, 2, 1>} : memref<10x10x8xf32, #tpu.memory_space<vmem>>, vector<4x4x8xf32>
    %141 = vector.shape_cast %140 : vector<4x4x8xf32> to vector<16x8xf32>
    %c2_201 = arith.constant 2 : index
    %c0_202 = arith.constant 0 : index
    %c0_203 = arith.constant 0 : index
    %c0_204 = arith.constant 0 : index
    %142 = vector.load %arg6[%c2_201, %c0_202, %c0_203, %c0_204] : memref<3x3x8x16xf32, #tpu.memory_space<vmem>>, vector<1x1x8x16xf32>
    %143 = vector.shape_cast %142 : vector<1x1x8x16xf32> to vector<8x16xf32>
    %cst_205 = arith.constant dense<0.000000e+00> : vector<16x16xf32>
    %144 = tpu.matmul %141, %143, %cst_205 {dimension_numbers = #tpu.dot_dimension_numbers<[1], [0], [0], [1], [0, 0, 1, 1], [], []>} : vector<16x8xf32>, vector<8x16xf32>, vector<16x16xf32> -> vector<16x16xf32>
    %145 = arith.addf %139, %144 : vector<16x16xf32>
    %c2_206 = arith.constant 2 : index
    %c1_207 = arith.constant 1 : index
    %c0_208 = arith.constant 0 : index
    %146 = tpu.strided_load %arg12[%c2_206, %c1_207, %c0_208] {strides = array<i32: 2, 2, 1>} : memref<10x10x8xf32, #tpu.memory_space<vmem>>, vector<4x4x8xf32>
    %147 = vector.shape_cast %146 : vector<4x4x8xf32> to vector<16x8xf32>
    %c2_209 = arith.constant 2 : index
    %c1_210 = arith.constant 1 : index
    %c0_211 = arith.constant 0 : index
    %c0_212 = arith.constant 0 : index
    %148 = vector.load %arg6[%c2_209, %c1_210, %c0_211, %c0_212] : memref<3x3x8x16xf32, #tpu.memory_space<vmem>>, vector<1x1x8x16xf32>
    %149 = vector.shape_cast %148 : vector<1x1x8x16xf32> to vector<8x16xf32>
    %cst_213 = arith.constant dense<0.000000e+00> : vector<16x16xf32>
    %150 = tpu.matmul %147, %149, %cst_213 {dimension_numbers = #tpu.dot_dimension_numbers<[1], [0], [0], [1], [0, 0, 1, 1], [], []>} : vector<16x8xf32>, vector<8x16xf32>, vector<16x16xf32> -> vector<16x16xf32>
    %151 = arith.addf %145, %150 : vector<16x16xf32>
    %c2_214 = arith.constant 2 : index
    %c2_215 = arith.constant 2 : index
    %c0_216 = arith.constant 0 : index
    %152 = tpu.strided_load %arg12[%c2_214, %c2_215, %c0_216] {strides = array<i32: 2, 2, 1>} : memref<10x10x8xf32, #tpu.memory_space<vmem>>, vector<4x4x8xf32>
    %153 = vector.shape_cast %152 : vector<4x4x8xf32> to vector<16x8xf32>
    %c2_217 = arith.constant 2 : index
    %c2_218 = arith.constant 2 : index
    %c0_219 = arith.constant 0 : index
    %c0_220 = arith.constant 0 : index
    %154 = vector.load %arg6[%c2_217, %c2_218, %c0_219, %c0_220] : memref<3x3x8x16xf32, #tpu.memory_space<vmem>>, vector<1x1x8x16xf32>
    %155 = vector.shape_cast %154 : vector<1x1x8x16xf32> to vector<8x16xf32>
    %cst_221 = arith.constant dense<0.000000e+00> : vector<16x16xf32>
    %156 = tpu.matmul %153, %155, %cst_221 {dimension_numbers = #tpu.dot_dimension_numbers<[1], [0], [0], [1], [0, 0, 1, 1], [], []>} : vector<16x8xf32>, vector<8x16xf32>, vector<16x16xf32> -> vector<16x16xf32>
    %157 = arith.addf %151, %156 : vector<16x16xf32>
    %cst_222 = arith.constant 0.000000e+00 : f32
    %158 = vector.broadcast %cst_222 : f32 to vector<16x16xf32>
    %159 = arith.maximumf %157, %158 : vector<16x16xf32>
    %160 = vector.shape_cast %92 : vector<64x16xf32> to vector<8x8x16xf32>
    %c1_223 = arith.constant 1 : index
    %c1_224 = arith.constant 1 : index
    %c0_225 = arith.constant 0 : index
    %161 = vector.load %arg13[%c1_223, %c1_224, %c0_225] : memref<10x10x16xf32, #tpu.memory_space<vmem>>, vector<8x8x16xf32>
    tpu.vector_store %arg13[%c1_223, %c1_224, %c0_225], %160 {strides = array<i32>} : memref<10x10x16xf32, #tpu.memory_space<vmem>>, vector<8x8x16xf32>,
    %c0_226 = arith.constant 0 : index
    %c0_227 = arith.constant 0 : index
    %c0_228 = arith.constant 0 : index
    %162 = tpu.strided_load %arg13[%c0_226, %c0_227, %c0_228] {strides = array<i32: 2, 2, 1>} : memref<10x10x16xf32, #tpu.memory_space<vmem>>, vector<4x4x16xf32>
    %c0_229 = arith.constant 0 : index
    %c1_230 = arith.constant 1 : index
    %c0_231 = arith.constant 0 : index
    %163 = tpu.strided_load %arg13[%c0_229, %c1_230, %c0_231] {strides = array<i32: 2, 2, 1>} : memref<10x10x16xf32, #tpu.memory_space<vmem>>, vector<4x4x16xf32>
    %164 = arith.maximumf %162, %163 : vector<4x4x16xf32>
    %c0_232 = arith.constant 0 : index
    %c2_233 = arith.constant 2 : index
    %c0_234 = arith.constant 0 : index
    %165 = tpu.strided_load %arg13[%c0_232, %c2_233, %c0_234] {strides = array<i32: 2, 2, 1>} : memref<10x10x16xf32, #tpu.memory_space<vmem>>, vector<4x4x16xf32>
    %166 = arith.maximumf %164, %165 : vector<4x4x16xf32>
    %c1_235 = arith.constant 1 : index
    %c0_236 = arith.constant 0 : index
    %c0_237 = arith.constant 0 : index
    %167 = tpu.strided_load %arg13[%c1_235, %c0_236, %c0_237] {strides = array<i32: 2, 2, 1>} : memref<10x10x16xf32, #tpu.memory_space<vmem>>, vector<4x4x16xf32>
    %168 = arith.maximumf %166, %167 : vector<4x4x16xf32>
    %c1_238 = arith.constant 1 : index
    %c1_239 = arith.constant 1 : index
    %c0_240 = arith.constant 0 : index
    %169 = tpu.strided_load %arg13[%c1_238, %c1_239, %c0_240] {strides = array<i32: 2, 2, 1>} : memref<10x10x16xf32, #tpu.memory_space<vmem>>, vector<4x4x16xf32>
    %170 = arith.maximumf %168, %169 : vector<4x4x16xf32>
    %c1_241 = arith.constant 1 : index
    %c2_242 = arith.constant 2 : index
    %c0_243 = arith.constant 0 : index
    %171 = tpu.strided_load %arg13[%c1_241, %c2_242, %c0_243] {strides = array<i32: 2, 2, 1>} : memref<10x10x16xf32, #tpu.memory_space<vmem>>, vector<4x4x16xf32>
    %172 = arith.maximumf %170, %171 : vector<4x4x16xf32>
    %c2_244 = arith.constant 2 : index
    %c0_245 = arith.constant 0 : index
    %c0_246 = arith.constant 0 : index
    %173 = tpu.strided_load %arg13[%c2_244, %c0_245, %c0_246] {strides = array<i32: 2, 2, 1>} : memref<10x10x16xf32, #tpu.memory_space<vmem>>, vector<4x4x16xf32>
    %174 = arith.maximumf %172, %173 : vector<4x4x16xf32>
    %c2_247 = arith.constant 2 : index
    %c1_248 = arith.constant 1 : index
    %c0_249 = arith.constant 0 : index
    %175 = tpu.strided_load %arg13[%c2_247, %c1_248, %c0_249] {strides = array<i32: 2, 2, 1>} : memref<10x10x16xf32, #tpu.memory_space<vmem>>, vector<4x4x16xf32>
    %176 = arith.maximumf %174, %175 : vector<4x4x16xf32>
    %c2_250 = arith.constant 2 : index
    %c2_251 = arith.constant 2 : index
    %c0_252 = arith.constant 0 : index
    %177 = tpu.strided_load %arg13[%c2_250, %c2_251, %c0_252] {strides = array<i32: 2, 2, 1>} : memref<10x10x16xf32, #tpu.memory_space<vmem>>, vector<4x4x16xf32>
    %178 = arith.maximumf %176, %177 : vector<4x4x16xf32>
    %179 = vector.shape_cast %178 : vector<4x4x16xf32> to vector<16x16xf32>
    %180 = vector.shape_cast %159 : vector<16x16xf32> to vector<4x4x16xf32>
    %c1_253 = arith.constant 1 : index
    %c1_254 = arith.constant 1 : index
    %c0_255 = arith.constant 0 : index
    %181 = vector.load %arg14[%c1_253, %c1_254, %c0_255] : memref<6x6x32xf32, #tpu.memory_space<vmem>>, vector<4x4x16xf32>
    tpu.vector_store %arg14[%c1_253, %c1_254, %c0_255], %180 {strides = array<i32>} : memref<6x6x32xf32, #tpu.memory_space<vmem>>, vector<4x4x16xf32>,
    %182 = vector.shape_cast %179 : vector<16x16xf32> to vector<4x4x16xf32>
    %c1_256 = arith.constant 1 : index
    %c1_257 = arith.constant 1 : index
    %c16 = arith.constant 16 : index
    %183 = vector.load %arg14[%c1_256, %c1_257, %c16] : memref<6x6x32xf32, #tpu.memory_space<vmem>>, vector<4x4x16xf32>
    tpu.vector_store %arg14[%c1_256, %c1_257, %c16], %182 {strides = array<i32>} : memref<6x6x32xf32, #tpu.memory_space<vmem>>, vector<4x4x16xf32>,
    %c0_258 = arith.constant 0 : index
    %c0_259 = arith.constant 0 : index
    %184 = vector.load %arg9[%c0_258, %c0_259] : memref<1x16xf32, #tpu.memory_space<vmem>>, vector<1x16xf32>
    %c0_260 = arith.constant 0 : index
    %c0_261 = arith.constant 0 : index
    %c0_262 = arith.constant 0 : index
    %185 = vector.load %arg14[%c0_260, %c0_261, %c0_262] : memref<6x6x32xf32, #tpu.memory_space<vmem>>, vector<4x4x32xf32>
    %186 = vector.shape_cast %185 : vector<4x4x32xf32> to vector<16x32xf32>
    %c0_263 = arith.constant 0 : index
    %c0_264 = arith.constant 0 : index
    %c0_265 = arith.constant 0 : index
    %c0_266 = arith.constant 0 : index
    %187 = vector.load %arg8[%c0_263, %c0_264, %c0_265, %c0_266] : memref<3x3x32x16xf32, #tpu.memory_space<vmem>>, vector<1x1x32x16xf32>
    %188 = vector.shape_cast %187 : vector<1x1x32x16xf32> to vector<32x16xf32>
    %cst_267 = arith.constant dense<0.000000e+00> : vector<16x16xf32>
    %189 = tpu.matmul %186, %188, %cst_267 {dimension_numbers = #tpu.dot_dimension_numbers<[1], [0], [0], [1], [0, 0, 1, 1], [], []>} : vector<16x32xf32>, vector<32x16xf32>, vector<16x16xf32> -> vector<16x16xf32>
    %190 = vector.broadcast %184 : vector<1x16xf32> to vector<16x16xf32>
    %191 = arith.addf %189, %190 : vector<16x16xf32>
    %c0_268 = arith.constant 0 : index
    %c1_269 = arith.constant 1 : index
    %c0_270 = arith.constant 0 : index
    %192 = vector.load %arg14[%c0_268, %c1_269, %c0_270] : memref<6x6x32xf32, #tpu.memory_space<vmem>>, vector<4x4x32xf32>
    %193 = vector.shape_cast %192 : vector<4x4x32xf32> to vector<16x32xf32>
    %c0_271 = arith.constant 0 : index
    %c1_272 = arith.constant 1 : index
    %c0_273 = arith.constant 0 : index
    %c0_274 = arith.constant 0 : index
    %194 = vector.load %arg8[%c0_271, %c1_272, %c0_273, %c0_274] : memref<3x3x32x16xf32, #tpu.memory_space<vmem>>, vector<1x1x32x16xf32>
    %195 = vector.shape_cast %194 : vector<1x1x32x16xf32> to vector<32x16xf32>
    %cst_275 = arith.constant dense<0.000000e+00> : vector<16x16xf32>
    %196 = tpu.matmul %193, %195, %cst_275 {dimension_numbers = #tpu.dot_dimension_numbers<[1], [0], [0], [1], [0, 0, 1, 1], [], []>} : vector<16x32xf32>, vector<32x16xf32>, vector<16x16xf32> -> vector<16x16xf32>
    %197 = arith.addf %191, %196 : vector<16x16xf32>
    %c0_276 = arith.constant 0 : index
    %c2_277 = arith.constant 2 : index
    %c0_278 = arith.constant 0 : index
    %198 = vector.load %arg14[%c0_276, %c2_277, %c0_278] : memref<6x6x32xf32, #tpu.memory_space<vmem>>, vector<4x4x32xf32>
    %199 = vector.shape_cast %198 : vector<4x4x32xf32> to vector<16x32xf32>
    %c0_279 = arith.constant 0 : index
    %c2_280 = arith.constant 2 : index
    %c0_281 = arith.constant 0 : index
    %c0_282 = arith.constant 0 : index
    %200 = vector.load %arg8[%c0_279, %c2_280, %c0_281, %c0_282] : memref<3x3x32x16xf32, #tpu.memory_space<vmem>>, vector<1x1x32x16xf32>
    %201 = vector.shape_cast %200 : vector<1x1x32x16xf32> to vector<32x16xf32>
    %cst_283 = arith.constant dense<0.000000e+00> : vector<16x16xf32>
    %202 = tpu.matmul %199, %201, %cst_283 {dimension_numbers = #tpu.dot_dimension_numbers<[1], [0], [0], [1], [0, 0, 1, 1], [], []>} : vector<16x32xf32>, vector<32x16xf32>, vector<16x16xf32> -> vector<16x16xf32>
    %203 = arith.addf %197, %202 : vector<16x16xf32>
    %c1_284 = arith.constant 1 : index
    %c0_285 = arith.constant 0 : index
    %c0_286 = arith.constant 0 : index
    %204 = vector.load %arg14[%c1_284, %c0_285, %c0_286] : memref<6x6x32xf32, #tpu.memory_space<vmem>>, vector<4x4x32xf32>
    %205 = vector.shape_cast %204 : vector<4x4x32xf32> to vector<16x32xf32>
    %c1_287 = arith.constant 1 : index
    %c0_288 = arith.constant 0 : index
    %c0_289 = arith.constant 0 : index
    %c0_290 = arith.constant 0 : index
    %206 = vector.load %arg8[%c1_287, %c0_288, %c0_289, %c0_290] : memref<3x3x32x16xf32, #tpu.memory_space<vmem>>, vector<1x1x32x16xf32>
    %207 = vector.shape_cast %206 : vector<1x1x32x16xf32> to vector<32x16xf32>
    %cst_291 = arith.constant dense<0.000000e+00> : vector<16x16xf32>
    %208 = tpu.matmul %205, %207, %cst_291 {dimension_numbers = #tpu.dot_dimension_numbers<[1], [0], [0], [1], [0, 0, 1, 1], [], []>} : vector<16x32xf32>, vector<32x16xf32>, vector<16x16xf32> -> vector<16x16xf32>
    %209 = arith.addf %203, %208 : vector<16x16xf32>
    %c1_292 = arith.constant 1 : index
    %c1_293 = arith.constant 1 : index
    %c0_294 = arith.constant 0 : index
    %210 = vector.load %arg14[%c1_292, %c1_293, %c0_294] : memref<6x6x32xf32, #tpu.memory_space<vmem>>, vector<4x4x32xf32>
    %211 = vector.shape_cast %210 : vector<4x4x32xf32> to vector<16x32xf32>
    %c1_295 = arith.constant 1 : index
    %c1_296 = arith.constant 1 : index
    %c0_297 = arith.constant 0 : index
    %c0_298 = arith.constant 0 : index
    %212 = vector.load %arg8[%c1_295, %c1_296, %c0_297, %c0_298] : memref<3x3x32x16xf32, #tpu.memory_space<vmem>>, vector<1x1x32x16xf32>
    %213 = vector.shape_cast %212 : vector<1x1x32x16xf32> to vector<32x16xf32>
    %cst_299 = arith.constant dense<0.000000e+00> : vector<16x16xf32>
    %214 = tpu.matmul %211, %213, %cst_299 {dimension_numbers = #tpu.dot_dimension_numbers<[1], [0], [0], [1], [0, 0, 1, 1], [], []>} : vector<16x32xf32>, vector<32x16xf32>, vector<16x16xf32> -> vector<16x16xf32>
    %215 = arith.addf %209, %214 : vector<16x16xf32>
    %c1_300 = arith.constant 1 : index
    %c2_301 = arith.constant 2 : index
    %c0_302 = arith.constant 0 : index
    %216 = vector.load %arg14[%c1_300, %c2_301, %c0_302] : memref<6x6x32xf32, #tpu.memory_space<vmem>>, vector<4x4x32xf32>
    %217 = vector.shape_cast %216 : vector<4x4x32xf32> to vector<16x32xf32>
    %c1_303 = arith.constant 1 : index
    %c2_304 = arith.constant 2 : index
    %c0_305 = arith.constant 0 : index
    %c0_306 = arith.constant 0 : index
    %218 = vector.load %arg8[%c1_303, %c2_304, %c0_305, %c0_306] : memref<3x3x32x16xf32, #tpu.memory_space<vmem>>, vector<1x1x32x16xf32>
    %219 = vector.shape_cast %218 : vector<1x1x32x16xf32> to vector<32x16xf32>
    %cst_307 = arith.constant dense<0.000000e+00> : vector<16x16xf32>
    %220 = tpu.matmul %217, %219, %cst_307 {dimension_numbers = #tpu.dot_dimension_numbers<[1], [0], [0], [1], [0, 0, 1, 1], [], []>} : vector<16x32xf32>, vector<32x16xf32>, vector<16x16xf32> -> vector<16x16xf32>
    %221 = arith.addf %215, %220 : vector<16x16xf32>
    %c2_308 = arith.constant 2 : index
    %c0_309 = arith.constant 0 : index
    %c0_310 = arith.constant 0 : index
    %222 = vector.load %arg14[%c2_308, %c0_309, %c0_310] : memref<6x6x32xf32, #tpu.memory_space<vmem>>, vector<4x4x32xf32>
    %223 = vector.shape_cast %222 : vector<4x4x32xf32> to vector<16x32xf32>
    %c2_311 = arith.constant 2 : index
    %c0_312 = arith.constant 0 : index
    %c0_313 = arith.constant 0 : index
    %c0_314 = arith.constant 0 : index
    %224 = vector.load %arg8[%c2_311, %c0_312, %c0_313, %c0_314] : memref<3x3x32x16xf32, #tpu.memory_space<vmem>>, vector<1x1x32x16xf32>
    %225 = vector.shape_cast %224 : vector<1x1x32x16xf32> to vector<32x16xf32>
    %cst_315 = arith.constant dense<0.000000e+00> : vector<16x16xf32>
    %226 = tpu.matmul %223, %225, %cst_315 {dimension_numbers = #tpu.dot_dimension_numbers<[1], [0], [0], [1], [0, 0, 1, 1], [], []>} : vector<16x32xf32>, vector<32x16xf32>, vector<16x16xf32> -> vector<16x16xf32>
    %227 = arith.addf %221, %226 : vector<16x16xf32>
    %c2_316 = arith.constant 2 : index
    %c1_317 = arith.constant 1 : index
    %c0_318 = arith.constant 0 : index
    %228 = vector.load %arg14[%c2_316, %c1_317, %c0_318] : memref<6x6x32xf32, #tpu.memory_space<vmem>>, vector<4x4x32xf32>
    %229 = vector.shape_cast %228 : vector<4x4x32xf32> to vector<16x32xf32>
    %c2_319 = arith.constant 2 : index
    %c1_320 = arith.constant 1 : index
    %c0_321 = arith.constant 0 : index
    %c0_322 = arith.constant 0 : index
    %230 = vector.load %arg8[%c2_319, %c1_320, %c0_321, %c0_322] : memref<3x3x32x16xf32, #tpu.memory_space<vmem>>, vector<1x1x32x16xf32>
    %231 = vector.shape_cast %230 : vector<1x1x32x16xf32> to vector<32x16xf32>
    %cst_323 = arith.constant dense<0.000000e+00> : vector<16x16xf32>
    %232 = tpu.matmul %229, %231, %cst_323 {dimension_numbers = #tpu.dot_dimension_numbers<[1], [0], [0], [1], [0, 0, 1, 1], [], []>} : vector<16x32xf32>, vector<32x16xf32>, vector<16x16xf32> -> vector<16x16xf32>
    %233 = arith.addf %227, %232 : vector<16x16xf32>
    %c2_324 = arith.constant 2 : index
    %c2_325 = arith.constant 2 : index
    %c0_326 = arith.constant 0 : index
    %234 = vector.load %arg14[%c2_324, %c2_325, %c0_326] : memref<6x6x32xf32, #tpu.memory_space<vmem>>, vector<4x4x32xf32>
    %235 = vector.shape_cast %234 : vector<4x4x32xf32> to vector<16x32xf32>
    %c2_327 = arith.constant 2 : index
    %c2_328 = arith.constant 2 : index
    %c0_329 = arith.constant 0 : index
    %c0_330 = arith.constant 0 : index
    %236 = vector.load %arg8[%c2_327, %c2_328, %c0_329, %c0_330] : memref<3x3x32x16xf32, #tpu.memory_space<vmem>>, vector<1x1x32x16xf32>
    %237 = vector.shape_cast %236 : vector<1x1x32x16xf32> to vector<32x16xf32>
    %cst_331 = arith.constant dense<0.000000e+00> : vector<16x16xf32>
    %238 = tpu.matmul %235, %237, %cst_331 {dimension_numbers = #tpu.dot_dimension_numbers<[1], [0], [0], [1], [0, 0, 1, 1], [], []>} : vector<16x32xf32>, vector<32x16xf32>, vector<16x16xf32> -> vector<16x16xf32>
    %239 = arith.addf %233, %238 : vector<16x16xf32>
    %cst_332 = arith.constant 0.000000e+00 : f32
    %240 = vector.broadcast %cst_332 : f32 to vector<16x16xf32>
    %241 = arith.maximumf %239, %240 : vector<16x16xf32>
    %242 = vector.shape_cast %241 : vector<16x16xf32> to vector<4x4x16xf32>
    %c0_333 = arith.constant 0 : index
    %c0_334 = arith.constant 0 : index
    %c0_335 = arith.constant 0 : index
    %c0_336 = arith.constant 0 : index
    %243 = vector.load %arg10[%c0_333, %c0_334, %c0_335, %c0_336] : memref<1x4x4x16xf32, #tpu.memory_space<vmem>>, vector<1x4x4x16xf32>
    %244 = vector.shape_cast %243 : vector<1x4x4x16xf32> to vector<4x4x16xf32>
    %245 = vector.shape_cast %242 : vector<4x4x16xf32> to vector<1x4x4x16xf32>
    tpu.vector_store %arg10[%c0_333, %c0_334, %c0_335, %c0_336], %245 {strides = array<i32>} : memref<1x4x4x16xf32, #tpu.memory_space<vmem>>, vector<1x4x4x16xf32>,
    return
  }
  func.func @transform_0(%arg0: i32) -> (i32, i32, i32, i32) {
    %c0_i32 = arith.constant 0 : i32
    %c0_i32_0 = arith.constant 0 : i32
    %c0_i32_1 = arith.constant 0 : i32
    %c0_i32_2 = arith.constant 0 : i32
    return %arg0, %c0_i32, %c0_i32_0, %c0_i32_1 : i32, i32, i32, i32
  }
  func.func @transform_1(%arg0: i32) -> (i32, i32, i32, i32) {
    %c0_i32 = arith.constant 0 : i32
    %c0_i32_0 = arith.constant 0 : i32
    %c0_i32_1 = arith.constant 0 : i32
    %c0_i32_2 = arith.constant 0 : i32
    %c0_i32_3 = arith.constant 0 : i32
    return %c0_i32, %c0_i32_0, %c0_i32_1, %c0_i32_2 : i32, i32, i32, i32
  }
  func.func @transform_2(%arg0: i32) -> (i32, i32) {
    %c0_i32 = arith.constant 0 : i32
    %c0_i32_0 = arith.constant 0 : i32
    %c0_i32_1 = arith.constant 0 : i32
    return %c0_i32, %c0_i32_0 : i32, i32
  }
  func.func @transform_3(%arg0: i32) -> (i32, i32) {
    %c0_i32 = arith.constant 0 : i32
    %c0_i32_0 = arith.constant 0 : i32
    %c0_i32_1 = arith.constant 0 : i32
    return %c0_i32, %c0_i32_0 : i32, i32
  }
  func.func @transform_4(%arg0: i32) -> (i32, i32) {
    %c0_i32 = arith.constant 0 : i32
    %c0_i32_0 = arith.constant 0 : i32
    %c0_i32_1 = arith.constant 0 : i32
    return %c0_i32, %c0_i32_0 : i32, i32
  }
  func.func @transform_5(%arg0: i32) -> (i32, i32, i32, i32) {
    %c0_i32 = arith.constant 0 : i32
    %c0_i32_0 = arith.constant 0 : i32
    %c0_i32_1 = arith.constant 0 : i32
    %c0_i32_2 = arith.constant 0 : i32
    %c0_i32_3 = arith.constant 0 : i32
    return %c0_i32, %c0_i32_0, %c0_i32_1, %c0_i32_2 : i32, i32, i32, i32
  }
  func.func @transform_6(%arg0: i32) -> (i32, i32) {
    %c0_i32 = arith.constant 0 : i32
    %c0_i32_0 = arith.constant 0 : i32
    %c0_i32_1 = arith.constant 0 : i32
    return %c0_i32, %c0_i32_0 : i32, i32
  }
  func.func @transform_7(%arg0: i32) -> (i32, i32, i32, i32) {
    %c0_i32 = arith.constant 0 : i32
    %c0_i32_0 = arith.constant 0 : i32
    %c0_i32_1 = arith.constant 0 : i32
    %c0_i32_2 = arith.constant 0 : i32
    %c0_i32_3 = arith.constant 0 : i32
    return %c0_i32, %c0_i32_0, %c0_i32_1, %c0_i32_2 : i32, i32, i32, i32
  }
  func.func @transform_8(%arg0: i32) -> (i32, i32) {
    %c0_i32 = arith.constant 0 : i32
    %c0_i32_0 = arith.constant 0 : i32
    %c0_i32_1 = arith.constant 0 : i32
    return %c0_i32, %c0_i32_0 : i32, i32
  }
  func.func @transform_9(%arg0: i32) -> (i32, i32, i32, i32) {
    %c0_i32 = arith.constant 0 : i32
    %c0_i32_0 = arith.constant 0 : i32
    %c0_i32_1 = arith.constant 0 : i32
    %c0_i32_2 = arith.constant 0 : i32
    return %arg0, %c0_i32, %c0_i32_0, %c0_i32_1 : i32, i32, i32, i32
  }
}

</mosaic_0001>

<bundles_post_ra>
// kernel: stem_block_forward.1
= control target key start
LH: loop header
LB: loop body
LE: loop exit
PB: predicated region body
PF: predicated region fallthrough
CT: control target
= control target key end

     0   :  { %14 = vsyncpa [#allocation7], 0  ;;  %s5785_s0 = inlined_call_operand.vmem [shape: f32[2,16,16,3], index: 0, kind: input, shape index: {}]   ;;  %s5786_s1 = inlined_call_operand.vmem [shape: f32[3,3,3,16], index: 1, kind: input, shape index: {}]   ;;  %s5787_s2 = inlined_call_operand.vmem [shape: f32[1,16], index: 2, kind: input, shape index: {}]   ;;  %s5788_s3 = inlined_call_operand.vmem [shape: f32[16,8], index: 3, kind: input, shape index: {}]   ;;  %s5789_s4 = inlined_call_operand.vmem [shape: f32[1,8], index: 4, kind: input, shape index: {}]   ;;  %s5790_s5 = inlined_call_operand.vmem [shape: f32[3,3,8,16], index: 5, kind: input, shape index: {}]   ;;  %s5791_s6 = inlined_call_operand.vmem [shape: f32[1,16], index: 6, kind: input, shape index: {}]   ;;  %s5792_s7 = inlined_call_operand.vmem [shape: f32[3,3,32,16], index: 7, kind: input, shape index: {}]   ;;  %s5793_s8 = inlined_call_operand.vmem [shape: f32[1,16], index: 8, kind: input, shape index: {}]   ;;  %s5794_s9 = inlined_call_operand.hbm [shape: f32[2,4,4,16], index: 9, kind: output, shape index: {}]  }
   0x1   :  { %16 = vsyncpa [#allocation7 + $0x1], 0  ;;  %s5183_s30 = smov 0   ;;  %s5185_s10 = smov 0  }
   0x2   :  { %s5187_s11 = smov 0   ;;  %s5189_s12 = smov 0  }
   0x3 LB: > { %s5204_s13 = sadd.s32 4294967295, %s5125_s12   ;;  %s4166_s14 = sadd.s32 4294967294, %s5125_s12   ;;  %s5125_s12 = sphi %s5189_s12, %s5800_s12   ;;  %s5121_s11 = sphi %s5187_s11, %s5799_s11   ;;  %s5117_s10 = sphi %s5185_s10, %s5798_s10   ;;  %s5113_s30 = sphi %s5183_s30, %s5797_s30  }
   0x4   : > { %s5208_s15 = sadd.s32 1, %s5125_s12   ;;  %s223_s16 = sadd.s32 1, %s5121_s11 }
   0x5   : > { %s220_s17 = ssub.s32 %s5125_s12, %s5208_s15  ;;  %p233_p0 = scmp.ne.s32.totalorder %s5121_s11, %s5117_s10 }
   0x6   : > { %p221_p1 = scmp.eq.s32.totalorder %s220_s17, 0  ;;  %p234_p2 = scmp.eq.s32.totalorder %s5204_s13, 1 }
   0x7   : > { %p239_p3 = scmp.ne.s32.totalorder %s5117_s10, %s5113_s30  ;;  %p240_p4 = scmp.eq.s32.totalorder %s4166_s14, 1 }
   0x8   : > { %s5219_s18 = scalar_select %p221_p1, %s5121_s11, %s223_s16  }
   0x9   : > { %p5221_p5 = por %p234_p2, %p233_p0  ;;  %p5225_p6 = por %p240_p4, %p239_p3 }
   0xa   : > { %p4169_p7 = scmp.ge.s32.totalorder %s5125_s12, 1  ;;  %p290_p8 = scmp.lt.s32.totalorder %s5125_s12, 3 }
   0xc   : > { %p291_p9 = pnand %p4169_p7, %p290_p8 }
   0xd   : > { %v531_v0 = vld [vmem:[%s5786_s1] sm:$0x7] (!%p291_p9)  ;;  %vm562_vm0 = vcmask (!%p291_p9), 1042432   ;;  %vm331_vm1 = vcmask (!%p291_p9), 23552   ;;  %vm340_vm2 = vcmask (!%p291_p9), 16384   ;;  %v5127_v1 = vmov (!%p291_p9), 0.0  }
   0xe   : > { %294 = sbr.rel (%p291_p9) target bundleno = 1199 (0x4af), region = 56  ;;  %4529 = vmatprep.subr.msk.mxu0 (!%p291_p9), %vm562_vm0, %v531_v0  ;;  %332 = vst.msk [vmem:[#allocation2] sm:$0xff] (!%p291_p9), %vm331_vm1, %v5127_v1  ;;  %333 = vst.msk [vmem:[#allocation2 + $0x8] sm:$0xff] (!%p291_p9), %vm331_vm1, %v5127_v1  ;;  %v4183_v2 = vld [vmem:[%s5786_s1 + $0x4] sm:$0x7] (!%p291_p9)  ;;  %p326_p10 = scmp.lt.s32.totalorder (!%p291_p9), %s5204_s13, 1  ;;  %4891 = vmatprep.subr.msk.mxu1 (!%p291_p9), %vm562_vm0, %v531_v0 }
   0xf   : > { %342 = vst.msk [vmem:[#allocation2 + $0x18] sm:$0x1] (!%p291_p9), %vm340_vm2, %v5127_v1  ;;  %343 = vst.msk [vmem:[#allocation2 + $0x30] sm:$0x1] (!%p291_p9), %vm340_vm2, %v5127_v1  ;;  %vm334_vm3 = vcmask (!%p291_p9), 17408   ;;  %4530 = vmatpush3.msk.msra.mxu0 (!%p291_p9), %vm562_vm0, %v531_v0  ;;  %4892 = vmatpush3.msk.msra.mxu1 (!%p291_p9), %vm562_vm0, %v531_v0  ;;  %vm405_vm4 = vcmask (!%p291_p9), 130048  }
  0x10   : > { %344 = vst.msk [vmem:[#allocation2 + $0x48] sm:$0x1] (!%p291_p9), %vm340_vm2, %v5127_v1  ;;  %345 = vst.msk [vmem:[#allocation2 + $0x60] sm:$0x1] (!%p291_p9), %vm340_vm2, %v5127_v1  ;;  %4543 = vmatprep.subr.msk.mxu0 (!%p291_p9), %vm562_vm0, %v4183_v2  ;;  %v4193_v27 = vld [vmem:[%s5786_s1 + $0x8] sm:$0x7] (!%p291_p9) }
  0x11   : > { %346 = vst.msk [vmem:[#allocation2 + $0x78] sm:$0x1] (!%p291_p9), %vm340_vm2, %v5127_v1  ;;  %347 = vst.msk [vmem:[#allocation2 + $0x90] sm:$0x1] (!%p291_p9), %vm340_vm2, %v5127_v1  ;;  %v4203_v32 = vld [vmem:[%s5786_s1 + $0xc] sm:$0x7] (!%p291_p9) }
  0x12   : > { %348 = vst.msk [vmem:[#allocation2 + $0xa8] sm:$0x1] (!%p291_p9), %vm340_vm2, %v5127_v1  ;;  %349 = vst.msk [vmem:[#allocation2 + $0xc0] sm:$0x1] (!%p291_p9), %vm340_vm2, %v5127_v1  ;;  %v5128_v37 = vmov (!%p291_p9), -inf   ;;  %v1942_v57 = vld [vmem:[%s5788_s3] sm:$0xff] (!%p291_p9) }
  0x13   : > { %350 = vst.msk [vmem:[#allocation2 + $0xd8] sm:$0x1] (!%p291_p9), %vm340_vm2, %v5127_v1  ;;  %351 = vst.msk [vmem:[#allocation2 + $0xf0] sm:$0x1] (!%p291_p9), %vm340_vm2, %v5127_v1  ;;  %v4213_v54 = vld [vmem:[%s5786_s1 + $0x10] sm:$0x7] (!%p291_p9) }
  0x14   : > { %352 = vst.msk [vmem:[#allocation2 + $0x108] sm:$0x1] (!%p291_p9), %vm340_vm2, %v5127_v1  ;;  %353 = vst.msk [vmem:[#allocation2 + $0x120] sm:$0x1] (!%p291_p9), %vm340_vm2, %v5127_v1  ;;  %v1943_v60 = vld [vmem:[%s5788_s3 + $0x8] sm:$0xff] (!%p291_p9)  ;;  %vm412_vm5 = vcmask (!%p291_p9), 122880  }
  0x15   : > { %354 = vst.msk [vmem:[#allocation2 + $0x138] sm:$0x1] %vm340_vm2, %v5127_v1  ;;  %355 = vst.msk [vmem:[#allocation2 + $0x150] sm:$0x1] %vm340_vm2, %v5127_v1  ;;  %s327_s25 = scalar_select %p326_p10, %s5204_s13, 1  ;;  %v4815_v62 = vpack.c.bf16 %v1943_v60, %v1942_v57  ;;  %vm407_vm6 = vcmask 123904  }
  0x16   : > { %356 = vst.msk [vmem:[#allocation2 + $0x168] sm:$0x1] %vm340_vm2, %v5127_v1  ;;  %357 = vst.msk [vmem:[#allocation2 + $0x180] sm:$0x1] %vm340_vm2, %v5127_v1  ;;  %v672_v17 = vld [vmem:[#allocation2 + $0x1] ss:$2 sm:$0xff] }
  0x17   : > { %341 = vst.msk [vmem:[#allocation2] sm:$0x1] %vm340_vm2, %v5127_v1  ;;  %s4355_s26 = sshll.u32 %s327_s25, 8  ;;  %4816 = vmatprep.subr.bf16.mxu1 %v4815_v62  ;;  %vm377_vm7 = vcmask 64512   ;;  %vm384_vm8 = vcmask 57344   ;;  %vm379_vm9 = vcmask 58368  }
  0x18   : > { %335 = vst.msk [vmem:[#allocation2 + $0x10] sm:$0x3] %vm334_vm3, %v5127_v1  ;;  %s5286_s29 = scalar_lea.vmem %s5785_s0, %s4355_s26  ;;  %s5129_s26 = smov 16   ;;  %vm433_vm10 = vcmask 259072   ;;  %vm437_vm11 = vcmask 253952   ;;  %vm3092_vm12 = vcmask 125952  }
  0x19   : > { %v452_v3 = vld [vmem:[%s5286_s29 + $0x10] sm:$0xff]  ;;  %v453_v4 = vld [vmem:[%s5286_s29 + $0x18] sm:$0xff]  ;;  %v450_v19 = vld [vmem:[%s5286_s29] sm:$0xff]  ;;  %406 = vst.msk [vmem:[#allocation4] sm:$0xff] %vm405_vm4, %v5128_v37  ;;  %vm3113_vm13 = vcmask 257152   ;;  %vm3139_vm14 = vcmask 261120  }
  0x1a   : > { %v456_v5 = vld [vmem:[%s5286_s29 + $0x30] sm:$0xff]  ;;  %485 = vst.msk [vmem:[#allocation2 + $0x31] sm:$0xff] %vm331_vm1, %v452_v3  ;;  %486 = vst.msk [vmem:[#allocation2 + $0x39] sm:$0xff] %vm331_vm1, %v453_v4  ;;  %v457_v6 = vld [vmem:[%s5286_s29 + $0x38] sm:$0xff]  ;;  %s323_s25 = sand.u32 1, %s5117_s10   ;;  %s4356_s16 = sshll.u32 %s5204_s13, 8 }
  0x1b   : > { %489 = vst.msk [vmem:[#allocation2 + $0x61] sm:$0xff] %vm331_vm1, %v456_v5  ;;  %v460_v7 = vld [vmem:[%s5286_s29 + $0x50] sm:$0xff]  ;;  %490 = vst.msk [vmem:[#allocation2 + $0x69] sm:$0xff] %vm331_vm1, %v457_v6  ;;  %v461_v9 = vld [vmem:[%s5286_s29 + $0x58] sm:$0xff]  ;;  %s5739_s22 = scalar_lea.hbm %s5794_s9, %s4356_s16  ;;  %s5744_s13 = scalar_lea.sflag [#allocation7], %s323_s25 }
  0x1c   : > { %493 = vst.msk [vmem:[#allocation2 + $0x91] sm:$0xff] %vm331_vm1, %v460_v7  ;;  %v464_v10 = vld [vmem:[%s5286_s29 + $0x70] sm:$0xff]  ;;  %494 = vst.msk [vmem:[#allocation2 + $0x99] sm:$0xff] %vm331_vm1, %v461_v9  ;;  %v465_v11 = vld [vmem:[%s5286_s29 + $0x78] sm:$0xff]  ;;  %s5130_s24 = smov [#allocation6]  }
  0x1d   : > { %497 = vst.msk [vmem:[#allocation2 + $0xc1] sm:$0xff] %vm331_vm1, %v464_v10  ;;  %v468_v12 = vld [vmem:[%s5286_s29 + $0x90] sm:$0xff]  ;;  %v469_v13 = vld [vmem:[%s5286_s29 + $0x98] sm:$0xff]  ;;  %498 = vst.msk [vmem:[#allocation2 + $0xc9] sm:$0xff] %vm331_vm1, %v465_v11 }
  0x1e   : > { %v516_v8 = vld [vmem:[#allocation2] ss:$2 sm:$0xff]  ;;  %501 = vst.msk [vmem:[#allocation2 + $0xf1] sm:$0xff] %vm331_vm1, %v468_v12  ;;  %502 = vst.msk [vmem:[#allocation2 + $0xf9] sm:$0xff] %vm331_vm1, %v469_v13  ;;  %v472_v14 = vld [vmem:[%s5286_s29 + $0xb0] sm:$0xff] }
  0x1f   : > { %4531 = vmatprep.mubr.msk.f32.mxu0 %vm331_vm1, %v516_v8  ;;  %v473_v15 = vld [vmem:[%s5286_s29 + $0xb8] sm:$0xff]  ;;  %v476_v16 = vld [vmem:[%s5286_s29 + $0xd0] sm:$0xff]  ;;  %505 = vst.msk [vmem:[#allocation2 + $0x121] sm:$0xff] %vm331_vm1, %v472_v14  ;;  %v451_v20 = vld [vmem:[%s5286_s29 + $0x8] sm:$0xff] }
  0x20   : > { %506 = vst.msk [vmem:[#allocation2 + $0x129] sm:$0xff] %vm331_vm1, %v473_v15  ;;  %v477_v18 = vld [vmem:[%s5286_s29 + $0xd8] sm:$0xff]  ;;  %509 = vst.msk [vmem:[#allocation2 + $0x151] sm:$0xff] %vm331_vm1, %v476_v16  ;;  %v454_v21 = vld [vmem:[%s5286_s29 + $0x20] sm:$0xff] }
  0x21   : > { %510 = vst.msk [vmem:[#allocation2 + $0x159] sm:$0xff] %vm331_vm1, %v477_v18  ;;  %483 = vst.msk [vmem:[#allocation2 + $0x19] sm:$0xff] %vm331_vm1, %v450_v19  ;;  %v455_v22 = vld [vmem:[%s5286_s29 + $0x28] sm:$0xff]  ;;  %v458_v23 = vld [vmem:[%s5286_s29 + $0x40] sm:$0xff] }
  0x22   : > { %484 = vst.msk [vmem:[#allocation2 + $0x21] sm:$0xff] %vm331_vm1, %v451_v20  ;;  %487 = vst.msk [vmem:[#allocation2 + $0x49] sm:$0xff] %vm331_vm1, %v454_v21  ;;  %v459_v24 = vld [vmem:[%s5286_s29 + $0x48] sm:$0xff]  ;;  %v462_v25 = vld [vmem:[%s5286_s29 + $0x60] sm:$0xff] }
  0x23   : > { %488 = vst.msk [vmem:[#allocation2 + $0x51] sm:$0xff] %vm331_vm1, %v455_v22  ;;  %v518_v26 = vld [vmem:[#allocation2 + $0x30] ss:$2 sm:$0xff]  ;;  %491 = vst.msk [vmem:[#allocation2 + $0x79] sm:$0xff] %vm331_vm1, %v458_v23  ;;  %v463_v28 = vld [vmem:[%s5286_s29 + $0x68] sm:$0xff] }
  0x24   : > { %492 = vst.msk [vmem:[#allocation2 + $0x81] sm:$0xff] %vm331_vm1, %v459_v24  ;;  %495 = vst.msk [vmem:[#allocation2 + $0xa9] sm:$0xff] %vm331_vm1, %v462_v25  ;;  %4532 = vmatmul.mubr.msk.f32.vlgmr.msra.gmra.mrb[0].mxu0 %vm331_vm1, %v518_v26  ;;  %v466_v29 = vld [vmem:[%s5286_s29 + $0x80] sm:$0xff]  ;;  %v467_v30 = vld [vmem:[%s5286_s29 + $0x88] sm:$0xff] }
  0x25   : > { %4544 = vmatpush3.msk.msra.mxu0 %vm562_vm0, %v4183_v2  ;;  %4545 = vmatprep.mubr.msk.f32.mxu0 %vm331_vm1, %v672_v17  ;;  %496 = vst.msk [vmem:[#allocation2 + $0xb1] sm:$0xff] %vm331_vm1, %v463_v28  ;;  %499 = vst.msk [vmem:[#allocation2 + $0xd9] sm:$0xff] %vm331_vm1, %v466_v29  ;;  %v674_v31 = vld [vmem:[#allocation2 + $0x31] ss:$2 sm:$0xff]  ;;  %v470_v33 = vld [vmem:[%s5286_s29 + $0xa0] sm:$0xff] }
  0x26   : > { %4557 = vmatprep.subr.msk.mxu0 %vm562_vm0, %v4193_v27  ;;  %500 = vst.msk [vmem:[#allocation2 + $0xe1] sm:$0xff] %vm331_vm1, %v467_v30  ;;  %v676_v34 = vld [vmem:[#allocation2 + $0x61] ss:$2 sm:$0xff]  ;;  %503 = vst.msk [vmem:[#allocation2 + $0x109] sm:$0xff] %vm331_vm1, %v470_v33  ;;  %v678_v41 = vld [vmem:[#allocation2 + $0x91] ss:$2 sm:$0xff] }
  0x27   : > { %v471_v35 = vld [vmem:[%s5286_s29 + $0xa8] sm:$0xff]  ;;  %v474_v36 = vld [vmem:[%s5286_s29 + $0xc0] sm:$0xff]  ;;  %v682_v43 = vld [vmem:[#allocation2 + $0xf1] ss:$2 sm:$0xff]  ;;  %413 = vst.msk [vmem:[#allocation4] sm:$0x1] %vm412_vm5, %v5128_v37 }
  0x28   : > { %504 = vst.msk [vmem:[#allocation2 + $0x111] sm:$0xff] %vm331_vm1, %v471_v35  ;;  %v475_v38 = vld [vmem:[%s5286_s29 + $0xc8] sm:$0xff]  ;;  %507 = vst.msk [vmem:[#allocation2 + $0x139] sm:$0xff] %vm331_vm1, %v474_v36  ;;  %v478_v39 = vld [vmem:[%s5286_s29 + $0xe0] sm:$0xff] }
  0x29   : > { %v479_v40 = vld [vmem:[%s5286_s29 + $0xe8] sm:$0xff]  ;;  %508 = vst.msk [vmem:[#allocation2 + $0x141] sm:$0xff] %vm331_vm1, %v475_v38  ;;  %511 = vst.msk [vmem:[#allocation2 + $0x169] sm:$0xff] %vm331_vm1, %v478_v39  ;;  %v686_v45 = vld [vmem:[#allocation2 + $0x151] ss:$2 sm:$0xff] }
  0x2a   : > { %512 = vst.msk [vmem:[#allocation2 + $0x171] sm:$0xff] %vm331_vm1, %v479_v40  ;;  %v680_v42 = vld [vmem:[#allocation2 + $0xc1] ss:$2 sm:$0xff]  ;;  %v480_v46 = vld [vmem:[%s5286_s29 + $0xf0] sm:$0xff]  ;;  %v481_v47 = vld [vmem:[%s5286_s29 + $0xf8] sm:$0xff] }
  0x2b   : > { %v684_v44 = vld [vmem:[#allocation2 + $0x121] ss:$2 sm:$0xff]  ;;  %v830_v48 = vld [vmem:[#allocation2 + $0x2] ss:$2 sm:$0xff]  ;;  %513 = vst.msk [vmem:[#allocation2 + $0x181] sm:$0xff] %vm331_vm1, %v480_v46  ;;  %514 = vst.msk [vmem:[#allocation2 + $0x189] sm:$0xff] %vm331_vm1, %v481_v47 }
  0x2c   : > { %4546 = vmatmul.mubr.msk.f32.vlgmr.msra.gmra.mrb[0].mxu0 %vm331_vm1, %v674_v31  ;;  %v520_v49 = vld [vmem:[#allocation2 + $0x60] ss:$2 sm:$0xff]  ;;  %v522_v51 = vld [vmem:[#allocation2 + $0x90] ss:$2 sm:$0xff]  ;;  %v1145_v12 = vld [vmem:[#allocation2 + $0x19] ss:$2 sm:$0xff] }
  0x2d   : > { %4558 = vmatpush3.msk.msra.mxu0 %vm562_vm0, %v4193_v27  ;;  %4548 = vmatprep.mubr.msk.f32.mxu0 %vm331_vm1, %v676_v34  ;;  %v832_v50 = vld [vmem:[#allocation2 + $0x32] ss:$2 sm:$0xff]  ;;  %v834_v52 = vld [vmem:[#allocation2 + $0x62] ss:$2 sm:$0xff]  ;;  %v1147_v13 = vld [vmem:[#allocation2 + $0x49] ss:$2 sm:$0xff] }
  0x2e   : > { %4571 = vmatprep.subr.msk.mxu0 %vm562_vm0, %v4203_v32  ;;  %4534 = vmatprep.mubr.msk.f32.mxu1 %vm331_vm1, %v520_v49  ;;  %v524_v53 = vld [vmem:[#allocation2 + $0xc0] ss:$2 sm:$0xff]  ;;  %v526_v55 = vld [vmem:[#allocation2 + $0xf0] ss:$2 sm:$0xff]  ;;  %v1149_v14 = vld [vmem:[#allocation2 + $0x79] ss:$2 sm:$0xff] }
  0x2f   : > { %4535 = vmatmul.mubr.msk.f32.vlgmr.msra.gmra.mrb[0].mxu1 %vm331_vm1, %v522_v51  ;;  %v528_v56 = vld [vmem:[#allocation2 + $0x120] ss:$2 sm:$0xff]  ;;  %v530_v61 = vld [vmem:[#allocation2 + $0x150] ss:$2 sm:$0xff]  ;;  %v1151_v16 = vld [vmem:[#allocation2 + $0xa9] ss:$2 sm:$0xff] }
  0x30   : > { %4549 = vmatmul.mubr.msk.f32.gmra.mrb[2].mxu0 %vm331_vm1, %v678_v41  ;;  %4537 = vmatprep.mubr.msk.f32.mxu1 %vm331_vm1, %v524_v53  ;;  %v836_v58 = vld [vmem:[#allocation2 + $0x92] ss:$2 sm:$0xff]  ;;  %v838_v59 = vld [vmem:[#allocation2 + $0xc2] ss:$2 sm:$0xff]  ;;  %v1153_v17 = vld [vmem:[#allocation2 + $0xd9] ss:$2 sm:$0xff] }
  0x31   : > { %4551 = vmatprep.mubr.msk.f32.mxu0 %vm331_vm1, %v680_v42  ;;  %v840_v63 = vld [vmem:[#allocation2 + $0xf2] ss:$2 sm:$0xff]  ;;  %v842_v0 = vld [vmem:[#allocation2 + $0x122] ss:$2 sm:$0xff]  ;;  %4818 = vmatpush3.bf16.msra.mxu1 %v4815_v62  ;;  %v1155_v18 = vld [vmem:[#allocation2 + $0x109] ss:$2 sm:$0xff] }
  0x32   : > { %v844_v2 = vld [vmem:[#allocation2 + $0x152] ss:$2 sm:$0xff]  ;;  %v1157_v19 = vld [vmem:[#allocation2 + $0x139] ss:$2 sm:$0xff]  ;;  %v1159_v20 = vld [vmem:[#allocation2 + $0x169] ss:$2 sm:$0xff] }
  0x33   : > { %4538 = vmatmul.mubr.msk.f32.gmra.mrb[2].mxu1 %vm331_vm1, %v526_v55  ;;  %v987_v3 = vld [vmem:[#allocation2 + $0x18] ss:$2 sm:$0xff]  ;;  %v989_v4 = vld [vmem:[#allocation2 + $0x48] ss:$2 sm:$0xff]  ;;  %v1619_v40 = vld [vmem:[#allocation2 + $0x31] ss:$2 sm:$0xff] }
  0x34   : > { %4552 = vmatmul.mubr.msk.f32.gmra.mrb[4].mxu0 %vm331_vm1, %v682_v43  ;;  %4540 = vmatprep.mubr.msk.f32.mxu1 %vm331_vm1, %v528_v56  ;;  %v991_v5 = vld [vmem:[#allocation2 + $0x78] ss:$2 sm:$0xff]  ;;  %v4223_v6 = vld [vmem:[%s5786_s1 + $0x14] sm:$0x7]  ;;  %v1621_v41 = vld [vmem:[#allocation2 + $0x61] ss:$2 sm:$0xff] }
  0x35   : > { %4554 = vmatprep.mubr.msk.f32.mxu0 %vm331_vm1, %v684_v44  ;;  %v993_v7 = vld [vmem:[#allocation2 + $0xa8] ss:$2 sm:$0xff]  ;;  %v995_v8 = vld [vmem:[#allocation2 + $0xd8] ss:$2 sm:$0xff]  ;;  %v1623_v42 = vld [vmem:[#allocation2 + $0x91] ss:$2 sm:$0xff] }
  0x36   : > { %v997_v9 = vld [vmem:[#allocation2 + $0x108] ss:$2 sm:$0xff]  ;;  %v999_v10 = vld [vmem:[#allocation2 + $0x138] ss:$2 sm:$0xff]  ;;  %v1625_v43 = vld [vmem:[#allocation2 + $0xc1] ss:$2 sm:$0xff] }
  0x37   : > { %4541 = vmatmul.mubr.msk.f32.gmra.mrb[4].mxu1 %vm331_vm1, %v530_v61  ;;  %v1001_v11 = vld [vmem:[#allocation2 + $0x168] ss:$2 sm:$0xff]  ;;  %v4233_v15 = vld [vmem:[%s5786_s1 + $0x18] sm:$0x7]  ;;  %v4243_v24 = vld [vmem:[%s5786_s1 + $0x1c] sm:$0x7] }
  0x38   : > { %4555 = vmatmul.mubr.msk.f32.gmra.mrb[6].mxu0 %vm331_vm1, %v686_v45  ;;  %v1303_v21 = vld [vmem:[#allocation2 + $0x1a] ss:$2 sm:$0xff]  ;;  %v1305_v22 = vld [vmem:[#allocation2 + $0x4a] ss:$2 sm:$0xff]  ;;  %v1627_v44 = vld [vmem:[#allocation2 + $0xf1] ss:$2 sm:$0xff] }
  0x39   : > { %4559 = vmatprep.mubr.msk.f32.mxu0 %vm331_vm1, %v830_v48  ;;  %v1307_v23 = vld [vmem:[#allocation2 + $0x7a] ss:$2 sm:$0xff]  ;;  %v1309_v25 = vld [vmem:[#allocation2 + $0xaa] ss:$2 sm:$0xff]  ;;  %v1629_v45 = vld [vmem:[#allocation2 + $0x121] ss:$2 sm:$0xff] }
  0x3a   : > { %v1311_v26 = vld [vmem:[#allocation2 + $0xda] ss:$2 sm:$0xff]  ;;  %v1313_v27 = vld [vmem:[#allocation2 + $0x10a] ss:$2 sm:$0xff]  ;;  %v1631_v46 = vld [vmem:[#allocation2 + $0x151] ss:$2 sm:$0xff] }
  0x3b   : > { %v1315_v28 = vld [vmem:[#allocation2 + $0x13a] ss:$2 sm:$0xff]  ;;  %v1317_v29 = vld [vmem:[#allocation2 + $0x16a] ss:$2 sm:$0xff]  ;;  %v1633_v47 = vld [vmem:[#allocation2 + $0x181] ss:$2 sm:$0xff] }
  0x3c   : > { %4560 = vmatmul.mubr.msk.f32.vlgmr.msra.gmra.mrb[0].mxu0 %vm331_vm1, %v832_v50  ;;  %v1461_v30 = vld [vmem:[#allocation2 + $0x30] ss:$2 sm:$0xff]  ;;  %v1463_v31 = vld [vmem:[#allocation2 + $0x60] ss:$2 sm:$0xff]  ;;  %414 = vst.msk [vmem:[#allocation4 + $0x10] sm:$0x1] %vm412_vm5, %v5128_v37 }
  0x3d   : > { %4572 = vmatpush3.msk.msra.mxu0 %vm562_vm0, %v4203_v32  ;;  %4562 = vmatprep.mubr.msk.f32.mxu0 %vm331_vm1, %v834_v52  ;;  %v1465_v32 = vld [vmem:[#allocation2 + $0x90] ss:$2 sm:$0xff]  ;;  %v4253_v33 = vld [vmem:[%s5786_s1 + $0x20] sm:$0x7]  ;;  %415 = vst.msk [vmem:[#allocation4 + $0x20] sm:$0x1] %vm412_vm5, %v5128_v37 }
  0x3e   : > { %4585 = vmatprep.subr.msk.mxu0 %vm562_vm0, %v4213_v54  ;;  %v1467_v34 = vld [vmem:[#allocation2 + $0xc0] ss:$2 sm:$0xff]  ;;  %v1469_v35 = vld [vmem:[#allocation2 + $0xf0] ss:$2 sm:$0xff]  ;;  %416 = vst.msk [vmem:[#allocation4 + $0x30] sm:$0x1] %vm412_vm5, %v5128_v37 }
  0x3f   : > { %v1471_v36 = vld [vmem:[#allocation2 + $0x120] ss:$2 sm:$0xff]  ;;  %v1473_v38 = vld [vmem:[#allocation2 + $0x150] ss:$2 sm:$0xff]  ;;  %417 = vst.msk [vmem:[#allocation4 + $0x40] sm:$0x1] %vm412_vm5, %v5128_v37 }
  0x40   : > { %4563 = vmatmul.mubr.msk.f32.gmra.mrb[2].mxu0 %vm331_vm1, %v836_v58  ;;  %v1475_v39 = vld [vmem:[#allocation2 + $0x180] ss:$2 sm:$0xff]  ;;  %418 = vst.msk [vmem:[#allocation4 + $0x50] sm:$0x1] %vm412_vm5, %v5128_v37  ;;  %419 = vst.msk [vmem:[#allocation4 + $0x60] sm:$0x1] %vm412_vm5, %v5128_v37 }
  0x41   : > { %4565 = vmatprep.mubr.msk.f32.mxu0 %vm331_vm1, %v838_v59  ;;  %v1777_v48 = vld [vmem:[#allocation2 + $0x32] ss:$2 sm:$0xff]  ;;  %v1779_v49 = vld [vmem:[#allocation2 + $0x62] ss:$2 sm:$0xff]  ;;  %420 = vst.msk [vmem:[#allocation4 + $0x70] sm:$0x1] %vm412_vm5, %v5128_v37 }
  0x42   : > { %v1781_v50 = vld [vmem:[#allocation2 + $0x92] ss:$2 sm:$0xff]  ;;  %v1783_v51 = vld [vmem:[#allocation2 + $0xc2] ss:$2 sm:$0xff]  ;;  %421 = vst.msk [vmem:[#allocation4 + $0x80] sm:$0x1] %vm412_vm5, %v5128_v37 }
  0x43   : > { %v1785_v52 = vld [vmem:[#allocation2 + $0xf2] ss:$2 sm:$0xff]  ;;  %v1787_v53 = vld [vmem:[#allocation2 + $0x122] ss:$2 sm:$0xff]  ;;  %408 = vst.msk [vmem:[#allocation4 + $0x8] sm:$0x3] %vm407_vm6, %v5128_v37 }
  0x44   : > { %4566 = vmatmul.mubr.msk.f32.gmra.mrb[4].mxu0 %vm331_vm1, %v840_v63  ;;  %v1791_v55 = vld [vmem:[#allocation2 + $0x182] ss:$2 sm:$0xff]  ;;  %v4173_v62 = vld [vmem:[%s5787_s2] ss:$0 sm:$0xff]  ;;  %378 = vst.msk [vmem:[#allocation3] sm:$0xff] %vm377_vm7, %v5127_v1 }
  0x45   : > { %4568 = vmatprep.mubr.msk.f32.mxu0 %vm331_vm1, %v842_v0  ;;  %385 = vst.msk [vmem:[#allocation3] sm:$0x1] %vm384_vm8, %v5127_v1  ;;  %387 = vst.msk [vmem:[#allocation3 + $0x20] sm:$0x1] %vm384_vm8, %v5127_v1 }
  0x46   : > { %386 = vst.msk [vmem:[#allocation3 + $0x10] sm:$0x1] %vm384_vm8, %v5127_v1  ;;  %388 = vst.msk [vmem:[#allocation3 + $0x30] sm:$0x1] %vm384_vm8, %v5127_v1 }
  0x47   : > { %389 = vst.msk [vmem:[#allocation3 + $0x40] sm:$0x1] %vm384_vm8, %v5127_v1  ;;  %390 = vst.msk [vmem:[#allocation3 + $0x50] sm:$0x1] %vm384_vm8, %v5127_v1 }
  0x48   : > { %4569 = vmatmul.mubr.msk.f32.gmra.mrb[6].mxu0 %vm331_vm1, %v844_v2  ;;  %391 = vst.msk [vmem:[#allocation3 + $0x60] sm:$0x1] %vm384_vm8, %v5127_v1  ;;  %392 = vst.msk [vmem:[#allocation3 + $0x70] sm:$0x1] %vm384_vm8, %v5127_v1 }
  0x49   : > { %4573 = vmatprep.mubr.msk.f32.mxu0 %vm331_vm1, %v987_v3  ;;  %393 = vst.msk [vmem:[#allocation3 + $0x80] sm:$0x1] %vm384_vm8, %v5127_v1 }
  0x4a   : > { %380 = vst.msk [vmem:[#allocation3 + $0x8] sm:$0x3] %vm379_vm9, %v5127_v1 }
  0x4b   : > { %434 = vst.msk [vmem:[#allocation5] sm:$0x3f] %vm433_vm10, %v5127_v1  ;;  %436 = vst.msk [vmem:[#allocation5 + $0x28] sm:$0x3f] %vm433_vm10, %v5127_v1 }
  0x4c   : > { %4574 = vmatmul.mubr.msk.f32.vlgmr.msra.gmra.mrb[0].mxu0 %vm331_vm1, %v989_v4  ;;  %439 = vst.msk [vmem:[#allocation5 + $0x8] sm:$0x1] %vm437_vm11, %v5127_v1  ;;  %440 = vst.msk [vmem:[#allocation5 + $0x10] sm:$0x1] %vm437_vm11, %v5127_v1 }
  0x4d   : > { %4586 = vmatpush3.msk.msra.mxu0 %vm562_vm0, %v4213_v54  ;;  %4576 = vmatprep.mubr.msk.f32.mxu0 %vm331_vm1, %v991_v5  ;;  %v1789_v54 = vld [vmem:[#allocation2 + $0x152] ss:$2 sm:$0xff]  ;;  %441 = vst.msk [vmem:[#allocation5 + $0x18] sm:$0x1] %vm437_vm11, %v5127_v1  ;;  %442 = vst.msk [vmem:[#allocation5 + $0x20] sm:$0x1] %vm437_vm11, %v5127_v1 }
  0x4e   : > { %4599 = vmatprep.subr.msk.mxu0 %vm562_vm0, %v4223_v6  ;;  %445 = vst.msk [vmem:[#allocation5 + $0xd] sm:$0x1] %vm437_vm11, %v5127_v1  ;;  %446 = vst.msk [vmem:[#allocation5 + $0x15] sm:$0x1] %vm437_vm11, %v5127_v1 }
  0x4f   : > { %447 = vst.msk [vmem:[#allocation5 + $0x1d] sm:$0x1] %vm437_vm11, %v5127_v1  ;;  %448 = vst.msk [vmem:[#allocation5 + $0x25] sm:$0x1] %vm437_vm11, %v5127_v1 }
  0x50   : > { %4577 = vmatmul.mubr.msk.f32.gmra.mrb[2].mxu0 %vm331_vm1, %v993_v7  ;;  %438 = vst.msk [vmem:[#allocation5] sm:$0x1] %vm437_vm11, %v5127_v1  ;;  %443 = vst.msk [vmem:[#allocation5 + $0x28] sm:$0x1] %vm437_vm11, %v5127_v1 }
  0x51   : > { %4579 = vmatprep.mubr.msk.f32.mxu0 %vm331_vm1, %v995_v8  ;;  %v2991_v8 = vld [vmem:[#allocation4 + $0x1] ss:$2 sm:$0xf]  ;;  %444 = vst.msk [vmem:[#allocation5 + $0x5] sm:$0x1] %vm437_vm11, %v5127_v1 }
  0x52   : > { %449 = vst.msk [vmem:[#allocation5 + $0x2d] sm:$0x1] %vm437_vm11, %v5127_v1 }
  0x54   : > { %4580 = vmatmul.mubr.msk.f32.gmra.mrb[4].mxu0 %vm331_vm1, %v997_v9 }
  0x55   : > { %4582 = vmatprep.mubr.msk.f32.mxu0 %vm331_vm1, %v999_v10 }
  0x58   : > { %4583 = vmatmul.mubr.msk.f32.gmra.mrb[6].mxu0 %vm331_vm1, %v1001_v11 }
  0x59   : > { %4587 = vmatprep.mubr.msk.f32.mxu0 %vm331_vm1, %v1145_v12 }
  0x5c   : > { %4588 = vmatmul.mubr.msk.f32.vlgmr.msra.gmra.mrb[0].mxu0 %vm331_vm1, %v1147_v13 }
  0x5d   : > { %4600 = vmatpush3.msk.msra.mxu0 %vm562_vm0, %v4223_v6  ;;  %4590 = vmatprep.mubr.msk.f32.mxu0 %vm331_vm1, %v1149_v14  ;;  %v2983_v6 = vld [vmem:[#allocation4] ss:$2 sm:$0xf] }
  0x5e   : > { %4613 = vmatprep.subr.msk.mxu0 %vm562_vm0, %v4233_v15 }
  0x60   : > { %4591 = vmatmul.mubr.msk.f32.gmra.mrb[2].mxu0 %vm331_vm1, %v1151_v16 }
  0x61   : > { %4593 = vmatprep.mubr.msk.f32.mxu0 %vm331_vm1, %v1153_v17  ;;  %v3003_v17 = vld [vmem:[#allocation4 + $0x2] ss:$2 sm:$0xf] }
  0x64   : > { %4594 = vmatmul.mubr.msk.f32.gmra.mrb[4].mxu0 %vm331_vm1, %v1155_v18 }
  0x65   : > { %4596 = vmatprep.mubr.msk.f32.mxu0 %vm331_vm1, %v1157_v19 }
  0x68   : > { %4597 = vmatmul.mubr.msk.f32.gmra.mrb[6].mxu0 %vm331_vm1, %v1159_v20 }
  0x69   : > { %4601 = vmatprep.mubr.msk.f32.mxu0 %vm331_vm1, %v1303_v21 }
  0x6c   : > { %4602 = vmatmul.mubr.msk.f32.vlgmr.msra.gmra.mrb[0].mxu0 %vm331_vm1, %v1305_v22 }
  0x6d   : > { %4614 = vmatpush3.msk.msra.mxu0 %vm562_vm0, %v4233_v15  ;;  %4604 = vmatprep.mubr.msk.f32.mxu0 %vm331_vm1, %v1307_v23  ;;  %v2998_v15 = vmax.f32 %v2983_v6, %v2991_v8 }
  0x6e   : > { %4627 = vmatprep.subr.msk.mxu0 %vm562_vm0, %v4243_v24 }
  0x70   : > { %4605 = vmatmul.mubr.msk.f32.gmra.mrb[2].mxu0 %vm331_vm1, %v1309_v25  ;;  %v3010_v25 = vmax.f32 %v2998_v15, %v3003_v17 }
  0x71   : > { %4607 = vmatprep.mubr.msk.f32.mxu0 %vm331_vm1, %v1311_v26 }
  0x74   : > { %4608 = vmatmul.mubr.msk.f32.gmra.mrb[4].mxu0 %vm331_vm1, %v1313_v27 }
  0x75   : > { %4610 = vmatprep.mubr.msk.f32.mxu0 %vm331_vm1, %v1315_v28 }
  0x78   : > { %4611 = vmatmul.mubr.msk.f32.gmra.mrb[6].mxu0 %vm331_vm1, %v1317_v29 }
  0x79   : > { %4615 = vmatprep.mubr.msk.f32.mxu0 %vm331_vm1, %v1461_v30 }
  0x7c   : > { %4616 = vmatmul.mubr.msk.f32.vlgmr.msra.gmra.mrb[0].mxu0 %vm331_vm1, %v1463_v31 }
  0x7d   : > { %4628 = vmatpush3.msk.msra.mxu0 %vm562_vm0, %v4243_v24  ;;  %4618 = vmatprep.mubr.msk.f32.mxu0 %vm331_vm1, %v1465_v32 }
  0x7e   : > { %4641 = vmatprep.subr.msk.mxu0 %vm562_vm0, %v4253_v33 }
  0x80   : > { %4619 = vmatmul.mubr.msk.f32.gmra.mrb[2].mxu0 %vm331_vm1, %v1467_v34 }
  0x81   : > { %4621 = vmatprep.mubr.msk.f32.mxu0 %vm331_vm1, %v1469_v35 }
  0x84   : > { %4622 = vmatmul.mubr.msk.f32.gmra.mrb[4].mxu0 %vm331_vm1, %v1471_v36 }
  0x85   : > { %4624 = vmatprep.mubr.msk.f32.mxu0 %vm331_vm1, %v1473_v38 }
  0x88   : > { %4625 = vmatmul.mubr.msk.f32.gmra.mrb[6].mxu0 %vm331_vm1, %v1475_v39 }
  0x89   : > { %4629 = vmatprep.mubr.msk.f32.mxu0 %vm331_vm1, %v1619_v40 }
  0x8c   : > { %4630 = vmatmul.mubr.msk.f32.vlgmr.msra.gmra.mrb[0].mxu0 %vm331_vm1, %v1621_v41 }
  0x8d   : > { %4642 = vmatpush3.msk.msra.mxu0 %vm562_vm0, %v4253_v33  ;;  %4632 = vmatprep.mubr.msk.f32.mxu0 %vm331_vm1, %v1623_v42 }
  0x90   : > { %4633 = vmatmul.mubr.msk.f32.gmra.mrb[2].mxu0 %vm331_vm1, %v1625_v43 }
  0x91   : > { %4635 = vmatprep.mubr.msk.f32.mxu0 %vm331_vm1, %v1627_v44 }
  0x94   : > { %4636 = vmatmul.mubr.msk.f32.gmra.mrb[4].mxu0 %vm331_vm1, %v1629_v45 }
  0x95   : > { %4638 = vmatprep.mubr.msk.f32.mxu0 %vm331_vm1, %v1631_v46 }
  0x98   : > { %4639 = vmatmul.mubr.msk.f32.gmra.mrb[6].mxu0 %vm331_vm1, %v1633_v47 }
  0x99   : > { %4643 = vmatprep.mubr.msk.f32.mxu0 %vm331_vm1, %v1777_v48 }
  0x9c   : > { %4644 = vmatmul.mubr.msk.f32.vlgmr.msra.gmra.mrb[0].mxu0 %vm331_vm1, %v1779_v49 }
  0x9d   : > { %4646 = vmatprep.mubr.msk.f32.mxu0 %vm331_vm1, %v1781_v50 }
  0xa0   : > { %4647 = vmatmul.mubr.msk.f32.gmra.mrb[2].mxu0 %vm331_vm1, %v1783_v51 }
  0xa1   : > { %4649 = vmatprep.mubr.msk.f32.mxu0 %vm331_vm1, %v1785_v52 }
  0xa4   : > { %4650 = vmatmul.mubr.msk.f32.gmra.mrb[4].mxu0 %vm331_vm1, %v1787_v53 }
  0xa5   : > { %4652 = vmatprep.mubr.msk.f32.mxu0 %vm331_vm1, %v1789_v54 }
  0xa8   : > { %4653 = vmatmul.mubr.msk.f32.gmra.mrb[6].mxu0 %vm331_vm1, %v1791_v55 }
 0x102   : > { %v4536_v56 = vpop.f32.mrb[0].mxu1 }
 0x103   : > { %v642_v57 = vpop.f32.mrb[1].mxu1  ;;  %v648_v2 = vadd.f32 %v4536_v56, %v4173_v62 }
 0x104   : > { %v643_v5 = vadd.f32 %v4173_v62, %v642_v57 }
 0x106   : > { %v4539_v58 = vpop.f32.mrb[2].mxu1 }
 0x107   : > { %v652_v59 = vpop.f32.mrb[3].mxu1  ;;  %v658_v11 = vadd.f32 %v4539_v58, %v4173_v62 }
 0x108   : > { %v653_v14 = vadd.f32 %v4173_v62, %v652_v59 }
 0x10a   : > { %v4542_v60 = vpop.f32.mrb[4].mxu1 }
 0x10b   : > { %v662_v61 = vpop.f32.mrb[5].mxu1  ;;  %v668_v22 = vadd.f32 %v4542_v60, %v4173_v62 }
 0x10c   : > { %v663_v24 = vadd.f32 %v4173_v62, %v662_v61 }
 0x16f   : > { %v4645_v63 = vpop.f32.mrb[0].mxu0 }
 0x170   : > { %v4893_v0 = vadd.f32 %v4645_v63, %v4173_v62  ;;  %v1887_v3 = vpop.f32.mrb[1].mxu0 }
 0x171   : > { %v4894_v4 = vadd.f32 %v4173_v62, %v1887_v3 }
 0x172   : > { %v1935_v7 = vmax.f32 %v4893_v0, 0.0 }
 0x173   : > { %v1934_v37 = vmax.f32 %v4894_v4, 0.0  ;;  %v4648_v9 = vpop.f32.mrb[2].mxu0 }
 0x174   : > { %2976 = vst.msk [vmem:[#allocation4 + $0x21] sm:$0xff] %vm405_vm4, %v1935_v7  ;;  %v4896_v10 = vadd.f32 %v4648_v9, %v648_v2  ;;  %v1897_v12 = vpop.f32.mrb[3].mxu0 }
 0x175   : > { %2975 = vst.msk [vmem:[#allocation4 + $0x11] sm:$0xff] %vm405_vm4, %v1934_v37  ;;  %v4898_v13 = vadd.f32 %v1897_v12, %v643_v5  ;;  %4659 = vmatprep.mubr.msk.f32.mxu1 %vm405_vm4, %v1934_v37 }
 0x176   : > { %v1937_v16 = vmax.f32 %v4896_v10, 0.0  ;;  %4660 = vmatmul.mubr.msk.f32.vlgmr.msra.gmra.mrb[6].mxu1 %vm405_vm4, %v1935_v7 }
 0x177   : > { %v1936_v18 = vmax.f32 %v4898_v13, 0.0  ;;  %v4651_v19 = vpop.f32.mrb[4].mxu0 }
 0x178   : > { %2978 = vst.msk [vmem:[#allocation4 + $0x41] sm:$0xff] %vm405_vm4, %v1937_v16  ;;  %v4900_v20 = vadd.f32 %v4651_v19, %v658_v11  ;;  %v1907_v21 = vpop.f32.mrb[5].mxu0 }
 0x179   : > { %2977 = vst.msk [vmem:[#allocation4 + $0x31] sm:$0xff] %vm405_vm4, %v1936_v18  ;;  %v4902_v23 = vadd.f32 %v1907_v21, %v653_v14  ;;  %4662 = vmatprep.mubr.msk.f32.mxu1 %vm405_vm4, %v1936_v18 }
 0x17a   : > { %v1939_v26 = vmax.f32 %v4900_v20, 0.0  ;;  %4663 = vmatmul.mubr.msk.f32.gmra.mrb[8].mxu1 %vm405_vm4, %v1937_v16 }
 0x17b   : > { %v1938_v27 = vmax.f32 %v4902_v23, 0.0  ;;  %v4654_v28 = vpop.f32.mrb[6].mxu0  ;;  %v2985_v40 = vld [vmem:[#allocation4 + $0x20] ss:$2 sm:$0xf] }
 0x17c   : > { %2980 = vst.msk [vmem:[#allocation4 + $0x61] sm:$0xff] %vm405_vm4, %v1939_v26  ;;  %v4904_v29 = vadd.f32 %v4654_v28, %v668_v22  ;;  %v1917_v30 = vpop.f32.mrb[7].mxu0  ;;  %v3014_v31 = vld [vmem:[#allocation4 + $0x10] ss:$2 sm:$0xf] }
 0x17d   : > { %2979 = vst.msk [vmem:[#allocation4 + $0x51] sm:$0xff] %vm405_vm4, %v1938_v27  ;;  %v4906_v32 = vadd.f32 %v1917_v30, %v663_v24  ;;  %4665 = vmatprep.mubr.msk.f32.mxu1 %vm405_vm4, %v1938_v27  ;;  %v3021_v33 = vmax.f32 %v3010_v25, %v3014_v31  ;;  %v3026_v35 = vld [vmem:[#allocation4 + $0x11] ss:$2 sm:$0xf] }
 0x17e   : > { %v1941_v34 = vmax.f32 %v4904_v29, 0.0  ;;  %4666 = vmatmul.mubr.msk.f32.gmra.mrb[10].mxu1 %vm405_vm4, %v1939_v26  ;;  %v3038_v39 = vld [vmem:[#allocation4 + $0x12] ss:$2 sm:$0xf] }
 0x17f   : > { %v1940_v36 = vmax.f32 %v4906_v32, 0.0  ;;  %v3033_v38 = vmax.f32 %v3021_v33, %v3026_v35  ;;  %v2993_v41 = vld [vmem:[#allocation4 + $0x21] ss:$2 sm:$0xf]  ;;  %v4275_v35 = vld [vmem:[%s5790_s5 + $0x8] sm:$0xff] }
 0x180   : > { %2982 = vst.msk [vmem:[#allocation4 + $0x81] sm:$0xff] %vm405_vm4, %v1941_v34  ;;  %v3050_v43 = vld [vmem:[#allocation4 + $0x20] ss:$2 sm:$0xf]  ;;  %v2999_v44 = vmax.f32 %v2985_v40, %v2993_v41 }
 0x181   : > { %2981 = vst.msk [vmem:[#allocation4 + $0x71] sm:$0xff] %vm405_vm4, %v1940_v36  ;;  %4668 = vmatprep.mubr.msk.f32.mxu1 %vm405_vm4, %v1940_v36  ;;  %v3045_v42 = vmax.f32 %v3033_v38, %v3038_v39  ;;  %v3005_v45 = vld [vmem:[#allocation4 + $0x22] ss:$2 sm:$0xf]  ;;  %v4263_v36 = vld [vmem:[%s5789_s4] ss:$0 sm:$0xff] }
 0x182   : > { %4669 = vmatmul.mubr.msk.f32.gmra.mrb[12].mxu1 %vm405_vm4, %v1941_v34  ;;  %v3016_v46 = vld [vmem:[#allocation4 + $0x30] ss:$2 sm:$0xf]  ;;  %v3011_v48 = vmax.f32 %v2999_v44, %v3005_v45  ;;  %v3062_v49 = vld [vmem:[#allocation4 + $0x21] ss:$2 sm:$0xf] }
 0x183   : > { %v3057_v47 = vmax.f32 %v3045_v42, %v3050_v43  ;;  %v2987_v50 = vld [vmem:[#allocation4 + $0x40] ss:$2 sm:$0xf]  ;;  %v2995_v53 = vld [vmem:[#allocation4 + $0x41] ss:$2 sm:$0xf] }
 0x184   : > { %v3022_v52 = vmax.f32 %v3011_v48, %v3016_v46  ;;  %v3074_v54 = vld [vmem:[#allocation4 + $0x22] ss:$2 sm:$0xf]  ;;  %v3028_v55 = vld [vmem:[#allocation4 + $0x31] ss:$2 sm:$0xf]  ;;  %v3000_v56 = vmax.f32 %v2987_v50, %v2995_v53 }
 0x185   : > { %v3069_v51 = vmax.f32 %v3057_v47, %v3062_v49  ;;  %v3007_v59 = vld [vmem:[#allocation4 + $0x42] ss:$2 sm:$0xf]  ;;  %v3018_v60 = vld [vmem:[#allocation4 + $0x50] ss:$2 sm:$0xf] }
 0x186   : > { %v3034_v58 = vmax.f32 %v3022_v52, %v3028_v55  ;;  %v3040_v61 = vld [vmem:[#allocation4 + $0x32] ss:$2 sm:$0xf]  ;;  %v3012_v62 = vmax.f32 %v3000_v56, %v3007_v59  ;;  %v2989_v0 = vld [vmem:[#allocation4 + $0x60] ss:$2 sm:$0xf] }
 0x187   : > { %v3081_v57 = vmax.f32 %v3069_v51, %v3074_v54  ;;  %v2997_v2 = vld [vmem:[#allocation4 + $0x61] ss:$2 sm:$0xf]  ;;  %v3052_v3 = vld [vmem:[#allocation4 + $0x40] ss:$2 sm:$0xf] }
 0x188   : > { %v3046_v63 = vmax.f32 %v3034_v58, %v3040_v61  ;;  %v3023_v4 = vmax.f32 %v3012_v62, %v3018_v60  ;;  %v3030_v5 = vld [vmem:[#allocation4 + $0x51] ss:$2 sm:$0xf]  ;;  %v3001_v6 = vmax.f32 %v2989_v0, %v2997_v2  ;;  %v3009_v8 = vld [vmem:[#allocation4 + $0x62] ss:$2 sm:$0xf] }
 0x189   : > { %3101 = vrot.lane.b32.xlu0 %v3081_v57, %s5129_s26  ;;  %v3020_v37 = vld [vmem:[#allocation4 + $0x70] ss:$2 sm:$0xf]  ;;  %v3064_v9 = vld [vmem:[#allocation4 + $0x41] ss:$2 sm:$0xf] }
 0x18a   : > { %v3058_v7 = vmax.f32 %v3046_v63, %v3052_v3  ;;  %v3035_v10 = vmax.f32 %v3023_v4, %v3030_v5  ;;  %v3013_v11 = vmax.f32 %v3001_v6, %v3009_v8  ;;  %v3042_v13 = vld [vmem:[#allocation4 + $0x52] ss:$2 sm:$0xf]  ;;  %v3076_v14 = vld [vmem:[#allocation4 + $0x42] ss:$2 sm:$0xf] }
 0x18b   : > { %v3054_v18 = vld [vmem:[#allocation4 + $0x60] ss:$2 sm:$0xf]  ;;  %v3032_v19 = vld [vmem:[#allocation4 + $0x71] ss:$2 sm:$0xf] }
 0x18c   : > { %v3070_v12 = vmax.f32 %v3058_v7, %v3064_v9  ;;  %v3047_v15 = vmax.f32 %v3035_v10, %v3042_v13  ;;  %v3024_v16 = vmax.f32 %v3013_v11, %v3020_v37  ;;  %v3066_v22 = vld [vmem:[#allocation4 + $0x61] ss:$2 sm:$0xf]  ;;  %v3044_v23 = vld [vmem:[#allocation4 + $0x72] ss:$2 sm:$0xf] }
 0x18d   : > { %v3078_v26 = vld [vmem:[#allocation4 + $0x62] ss:$2 sm:$0xf]  ;;  %v3068_v30 = vld [vmem:[#allocation4 + $0x81] ss:$2 sm:$0xf] }
 0x18e   : > { %v3082_v17 = vmax.f32 %v3070_v12, %v3076_v14  ;;  %v3059_v20 = vmax.f32 %v3047_v15, %v3054_v18  ;;  %v3036_v21 = vmax.f32 %v3024_v16, %v3032_v19  ;;  %v3056_v27 = vld [vmem:[#allocation4 + $0x80] ss:$2 sm:$0xf]  ;;  %v2105_v34 = vld [vmem:[%s5790_s5] sm:$0xff]  ;;  %v4281_v14 = vld [vmem:[%s5790_s5 + $0x18] sm:$0xff] }
 0x18f   : > { %v3080_v32 = vld [vmem:[#allocation4 + $0x82] ss:$2 sm:$0xf]  ;;  %4671 = vmatprep.subr.mxu1 %v2105_v34  ;;  %v2198_v2 = vld [vmem:[#allocation3 + $0x1] ss:$2 sm:$0xf] }
 0x190   : > { %3103 = vrot.lane.b32.xlu0 %v3082_v17, %s5129_s26  ;;  %v3071_v24 = vmax.f32 %v3059_v20, %v3066_v22  ;;  %v3048_v25 = vmax.f32 %v3036_v21, %v3044_v23  ;;  %4672 = vmatpush3.msra.mxu1 %v2105_v34  ;;  %v2098_v54 = vld [vmem:[#allocation3] ss:$2 sm:$0xf]  ;;  %v4284_v21 = vld [vmem:[%s5790_s5 + $0x20] sm:$0xff] }
 0x191   : > { %4676 = vmatprep.subr.mxu1 %v4275_v35  ;;  %v4278_v8 = vld [vmem:[%s5790_s5 + $0x10] sm:$0xff] }
 0x192   : > { %v3083_v28 = vmax.f32 %v3071_v24, %v3078_v26  ;;  %v3060_v29 = vmax.f32 %v3048_v25, %v3056_v27  ;;  %v2295_v9 = vld [vmem:[#allocation3 + $0x2] ss:$2 sm:$0xf] }
 0x194   : > { %3105 = vrot.lane.b32.xlu1 %v3083_v28, %s5129_s26  ;;  %v3072_v31 = vmax.f32 %v3060_v29, %v3068_v30  ;;  %v4287_v28 = vld [vmem:[%s5790_s5 + $0x28] sm:$0xff] }
 0x196   : > { %v3084_v33 = vmax.f32 %v3072_v31, %v3080_v32 }
 0x198   : > { %3107 = vrot.lane.b32.xlu1 %v3084_v33, %s5129_s26  ;;  %s4170_s26 = sshll.u32 %s323_s25, 4 }
 0x199   : > { %s325_s29 = scalar_lea.vmem [#allocation6], %s4170_s26  ;;  %s5067_s26 = sshll.u32 %s5130_s24, 4  ;;  %s5068_s26 = int_to_ptr.vmem [resolvable:$false] %s5067_s26 }
 0x19a   : > { %s4014_s14 = sshll.u32 %s325_s29, 4  ;;  %s5069_s27 = scalar_lea.vmem %s5068_s26, 512  ;;  %s5734_s14 = int_to_ptr.vmem [resolvable:$true] %s4014_s14 }
 0x19b   : > { %s5063_s23 = scalar_lea.vmem %s5734_s14, 256  ;;  %p5070_p0 = scmp.lt.s32.totalorder %s5734_s14, %s5068_s26 }
 0x19c   : > { %p5064_p11 = scmp.ne.s32.totalorder %s5734_s14, %s5063_s23  ;;  %p5071_p1 = scmp.lt.s32.totalorder %s5069_s27, %s5063_s23 }
 0x19e   : > { %p5065_p12 = pnand %p5064_p11, %p5221_p5  ;;  %p5072_p2 = por %p5071_p1, %p5070_p0 }
 0x1a0   : > { %p5066_p13 = pneg %p5065_p12 }
 0x1a2   : > { %p5073_p3 = pnand %p5072_p2, %p5066_p13 }
 0x206   : > { %v3106_v1 = vpop.permute.xlu1 %3105 }
 0x249   : > { %v4661_v38 = vpop.f32.mrb[6].mxu1 }
 0x24a   : > { %v2047_v39 = vadd.f32 %v4661_v38, %v4263_v36  ;;  %v2041_v40 = vpop.f32.mrb[7].mxu1 }
 0x24b   : > { %v2042_v41 = vadd.f32 %v4263_v36, %v2041_v40 }
 0x24c   : > { %v2081_v42 = vmax.f32 %v2047_v39, 0.0 }
 0x24d   : > { %v2080_v43 = vmax.f32 %v2042_v41, 0.0  ;;  %v4664_v44 = vpop.f32.mrb[8].mxu1 }
 0x24e   : > { %2090 = vst.msk [vmem:[#allocation3 + $0x21] sm:$0xff] %vm377_vm7, %v2081_v42  ;;  %v2057_v45 = vadd.f32 %v4664_v44, %v4263_v36  ;;  %v2051_v46 = vpop.f32.mrb[9].mxu1 }
 0x24f   : > { %2089 = vst.msk [vmem:[#allocation3 + $0x11] sm:$0xff] %vm377_vm7, %v2080_v43  ;;  %v2052_v47 = vadd.f32 %v4263_v36, %v2051_v46  ;;  %v4293_v43 = vld [vmem:[%s5790_s5 + $0x38] sm:$0xff] }
 0x250   : > { %v2083_v48 = vmax.f32 %v2057_v45, 0.0 }
 0x251   : > { %v2082_v49 = vmax.f32 %v2052_v47, 0.0  ;;  %v4667_v50 = vpop.f32.mrb[10].mxu1 }
 0x252   : > { %2092 = vst.msk [vmem:[#allocation3 + $0x41] sm:$0xff] %vm377_vm7, %v2083_v48  ;;  %v2067_v51 = vadd.f32 %v4667_v50, %v4263_v36  ;;  %v2061_v52 = vpop.f32.mrb[11].mxu1  ;;  %v4296_v50 = vld [vmem:[%s5790_s5 + $0x40] sm:$0xff] }
 0x253   : > { %2091 = vst.msk [vmem:[#allocation3 + $0x31] sm:$0xff] %vm377_vm7, %v2082_v49  ;;  %v2062_v53 = vadd.f32 %v4263_v36, %v2061_v52 }
 0x254   : > { %v2085_v55 = vmax.f32 %v2067_v51, 0.0 }
 0x255   : > { %v2084_v56 = vmax.f32 %v2062_v53, 0.0  ;;  %v4670_v57 = vpop.f32.mrb[12].mxu1  ;;  %v2100_v58 = vld [vmem:[#allocation3 + $0x20] ss:$2 sm:$0xf] }
 0x256   : > { %2094 = vst.msk [vmem:[#allocation3 + $0x61] sm:$0xff] %vm377_vm7, %v2085_v55  ;;  %v2077_v59 = vadd.f32 %v4670_v57, %v4263_v36  ;;  %v2071_v60 = vpop.f32.mrb[13].mxu1  ;;  %v2116_v61 = vcombine.low %v2098_v54, %v2100_v58  ;;  %v2200_v3 = vld [vmem:[#allocation3 + $0x21] ss:$2 sm:$0xf] }
 0x257   : > { %2093 = vst.msk [vmem:[#allocation3 + $0x51] sm:$0xff] %vm377_vm7, %v2084_v56  ;;  %v2072_v62 = vadd.f32 %v4263_v36, %v2071_v60  ;;  %v2211_v7 = vcombine.low %v2198_v2, %v2200_v3  ;;  %v2297_v10 = vld [vmem:[#allocation3 + $0x22] ss:$2 sm:$0xf]  ;;  %v3123_v60 = vld [vmem:[%s5792_s7] sm:$0xff] }
 0x258   : > { %v2087_v63 = vmax.f32 %v2077_v59, 0.0  ;;  %4673 = vmatprep.mubr.msk.f32.mxu1 %vm377_vm7, %v2116_v61  ;;  %v2308_v13 = vcombine.low %v2295_v9, %v2297_v10  ;;  %v2391_v19 = vld [vmem:[#allocation3 + $0x10] ss:$2 sm:$0xf]  ;;  %v3124_v61 = vld [vmem:[%s5792_s7 + $0x8] sm:$0xff]  ;;  %v3102_v9 = vpop.permute.xlu0 %3101 }
 0x259   : > { %v2086_v0 = vmax.f32 %v2072_v62, 0.0  ;;  %v2102_v4 = vld [vmem:[#allocation3 + $0x40] ss:$2 sm:$0xf]  ;;  %v4302_v3 = vld [vmem:[%s5792_s7 + $0x20] sm:$0xff] }
 0x25a   : > { %2096 = vst.msk [vmem:[#allocation3 + $0x81] sm:$0xff] %vm377_vm7, %v2087_v63  ;;  %v2202_v11 = vld [vmem:[#allocation3 + $0x41] ss:$2 sm:$0xf]  ;;  %v4819_v63 = vpack.c.bf16 %v3124_v61, %v3123_v60  ;;  %v4335_v60 = vld [vmem:[%s5792_s7 + $0xd8] sm:$0xff] }
 0x25b   : > { %2095 = vst.msk [vmem:[#allocation3 + $0x71] sm:$0xff] %vm377_vm7, %v2086_v0  ;;  %v2393_v16 = vld [vmem:[#allocation3 + $0x30] ss:$2 sm:$0xf]  ;;  %v3125_v62 = vld [vmem:[%s5792_s7 + $0x10] sm:$0xff]  ;;  %v3126_v0 = vld [vmem:[%s5792_s7 + $0x18] sm:$0xff] }
 0x25c   : > { %v2299_v17 = vld [vmem:[#allocation3 + $0x42] ss:$2 sm:$0xf]  ;;  %v2404_v20 = vcombine.low %v2391_v19, %v2393_v16  ;;  %v2490_v23 = vld [vmem:[#allocation3 + $0x31] ss:$2 sm:$0xf]  ;;  %v4823_v2 = vpack.c.bf16 %v3126_v0, %v3125_v62  ;;  %v3104_v16 = vpop.permute.xlu0 %3103 }
 0x25d   : > { %v2104_v5 = vld [vmem:[#allocation3 + $0x60] ss:$2 sm:$0xf]  ;;  %v2204_v37 = vld [vmem:[#allocation3 + $0x61] ss:$2 sm:$0xf] }
 0x25e   : > { %v2117_v6 = vcombine.low %v2102_v4, %v2104_v5  ;;  %v2212_v12 = vcombine.low %v2202_v11, %v2204_v37  ;;  %v2301_v15 = vld [vmem:[#allocation3 + $0x62] ss:$2 sm:$0xf]  ;;  %v2395_v24 = vld [vmem:[#allocation3 + $0x50] ss:$2 sm:$0xf] }
 0x25f   : > { %v2309_v18 = vcombine.low %v2299_v17, %v2301_v15  ;;  %v2488_v26 = vld [vmem:[#allocation3 + $0x11] ss:$2 sm:$0xf]  ;;  %v2587_v30 = vld [vmem:[#allocation3 + $0x32] ss:$2 sm:$0xf]  ;;  %v3108_v15 = vpop.permute.xlu1 %3107 }
 0x260   : > { %4674 = vmatmul.mubr.msk.f32.vlgmr.msra.gmra.mrb[14].mxu1 %vm377_vm7, %v2117_v6  ;;  %v2501_v27 = vcombine.low %v2488_v26, %v2490_v23  ;;  %v2492_v31 = vld [vmem:[#allocation3 + $0x51] ss:$2 sm:$0xf]  ;;  %v2585_v33 = vld [vmem:[#allocation3 + $0x12] ss:$2 sm:$0xf] }
 0x261   : > { %4677 = vmatpush3.msra.mxu1 %v4275_v35  ;;  %4678 = vmatprep.mubr.msk.f32.mxu1 %vm377_vm7, %v2211_v7  ;;  %v2598_v34 = vcombine.low %v2585_v33, %v2587_v30  ;;  %v4290_v35 = vld [vmem:[%s5790_s5 + $0x30] sm:$0xff]  ;;  %v2589_v39 = vld [vmem:[#allocation3 + $0x52] ss:$2 sm:$0xf]  ;;  %v4272_v6 = vld [vmem:[%s5791_s6] ss:$0 sm:$0xff] }
 0x262   : > { %4681 = vmatprep.subr.mxu1 %v4278_v8  ;;  %v2397_v22 = vld [vmem:[#allocation3 + $0x70] ss:$2 sm:$0xf]  ;;  %v2494_v29 = vld [vmem:[#allocation3 + $0x71] ss:$2 sm:$0xf] }
 0x263   : > { %v2405_v25 = vcombine.low %v2395_v24, %v2397_v22  ;;  %v2502_v32 = vcombine.low %v2492_v31, %v2494_v29  ;;  %v2591_v36 = vld [vmem:[#allocation3 + $0x72] ss:$2 sm:$0xf]  ;;  %v2684_v38 = vld [vmem:[#allocation3 + $0x40] ss:$2 sm:$0xf] }
 0x264   : > { %v2599_v40 = vcombine.low %v2589_v39, %v2591_v36  ;;  %v2682_v41 = vld [vmem:[#allocation3 + $0x20] ss:$2 sm:$0xf]  ;;  %v2781_v45 = vld [vmem:[#allocation3 + $0x41] ss:$2 sm:$0xf] }
 0x265   : > { %v2695_v42 = vcombine.low %v2682_v41, %v2684_v38  ;;  %v2688_v44 = vld [vmem:[#allocation3 + $0x80] ss:$2 sm:$0xf]  ;;  %v2779_v48 = vld [vmem:[#allocation3 + $0x21] ss:$2 sm:$0xf] }
 0x266   : > { %v2686_v46 = vld [vmem:[#allocation3 + $0x60] ss:$2 sm:$0xf]  ;;  %v2792_v49 = vcombine.low %v2779_v48, %v2781_v45  ;;  %v2785_v51 = vld [vmem:[#allocation3 + $0x81] ss:$2 sm:$0xf] }
 0x267   : > { %v2696_v47 = vcombine.low %v2686_v46, %v2688_v44  ;;  %v2878_v52 = vld [vmem:[#allocation3 + $0x42] ss:$2 sm:$0xf]  ;;  %v2783_v53 = vld [vmem:[#allocation3 + $0x61] ss:$2 sm:$0xf] }
 0x268   : > { %4679 = vmatmul.mubr.msk.f32.vlgmr.msra.gmra.mrb[14].mxu1 %vm377_vm7, %v2212_v12  ;;  %v2793_v54 = vcombine.low %v2783_v53, %v2785_v51  ;;  %v2876_v55 = vld [vmem:[#allocation3 + $0x22] ss:$2 sm:$0xf]  ;;  %v4303_v4 = vld [vmem:[%s5792_s7 + $0x28] sm:$0xff]  ;;  %v4326_v48 = vld [vmem:[%s5792_s7 + $0xa0] sm:$0xff] }
 0x269   : > { %4682 = vmatpush3.msra.mxu1 %v4278_v8  ;;  %4683 = vmatprep.mubr.msk.f32.mxu1 %vm377_vm7, %v2308_v13  ;;  %v2889_v56 = vcombine.low %v2876_v55, %v2878_v52  ;;  %v2882_v57 = vld [vmem:[#allocation3 + $0x82] ss:$2 sm:$0xf]  ;;  %v4827_v5 = vpack.c.bf16 %v4303_v4, %v4302_v3  ;;  %v4309_v24 = vld [vmem:[%s5792_s7 + $0x48] sm:$0xff]  ;;  %v4338_v0 = vld [vmem:[%s5792_s7 + $0xe0] sm:$0xff] }
 0x26a   : > { %4686 = vmatprep.subr.mxu1 %v4281_v14  ;;  %v2880_v58 = vld [vmem:[#allocation3 + $0x62] ss:$2 sm:$0xf]  ;;  %v4315_v29 = vld [vmem:[%s5792_s7 + $0x68] sm:$0xff] }
 0x26b   : > { %v2890_v59 = vcombine.low %v2880_v58, %v2882_v57  ;;  %v4304_v17 = vld [vmem:[%s5792_s7 + $0x30] sm:$0xff]  ;;  %v4321_v41 = vld [vmem:[%s5792_s7 + $0x88] sm:$0xff]  ;;  %v4323_v44 = vld [vmem:[%s5792_s7 + $0x98] sm:$0xff] }
 0x26c   : > { %v4310_v26 = vld [vmem:[%s5792_s7 + $0x50] sm:$0xff]  ;;  %v4329_v52 = vld [vmem:[%s5792_s7 + $0xb8] sm:$0xff]  ;;  %v4333_v57 = vld [vmem:[%s5792_s7 + $0xc8] sm:$0xff] }
 0x26d   : > { %v4328_v51 = vld [vmem:[%s5792_s7 + $0xb0] sm:$0xff] }
 0x26e   : > { %v4340_v4 = vld [vmem:[%s5792_s7 + $0xf0] sm:$0xff] }
 0x270   : > { %4684 = vmatmul.mubr.msk.f32.vlgmr.msra.gmra.mrb[14].mxu1 %vm377_vm7, %v2309_v18  ;;  %v4305_v18 = vld [vmem:[%s5792_s7 + $0x38] sm:$0xff] }
 0x271   : > { %4687 = vmatpush3.msra.mxu1 %v4281_v14  ;;  %4688 = vmatprep.mubr.msk.f32.mxu1 %vm377_vm7, %v2404_v20  ;;  %v4308_v20 = vld [vmem:[%s5792_s7 + $0x40] sm:$0xff]  ;;  %v4831_v22 = vpack.c.bf16 %v4305_v18, %v4304_v17 }
 0x272   : > { %4691 = vmatprep.subr.mxu1 %v4284_v21 }
 0x278   : > { %4689 = vmatmul.mubr.msk.f32.vlgmr.msra.gmra.mrb[14].mxu1 %vm377_vm7, %v2405_v25  ;;  %v4835_v25 = vpack.c.bf16 %v4309_v24, %v4308_v20 }
 0x279   : > { %4692 = vmatpush3.msra.mxu1 %v4284_v21  ;;  %4693 = vmatprep.mubr.msk.f32.mxu1 %vm377_vm7, %v2501_v27  ;;  %v4311_v27 = vld [vmem:[%s5792_s7 + $0x58] sm:$0xff] }
 0x27a   : > { %4696 = vmatprep.subr.mxu1 %v4287_v28  ;;  %v4839_v31 = vpack.c.bf16 %v4311_v27, %v4310_v26 }
 0x280   : > { %4694 = vmatmul.mubr.msk.f32.vlgmr.msra.gmra.mrb[14].mxu1 %vm377_vm7, %v2502_v32 }
 0x281   : > { %4697 = vmatpush3.msra.mxu1 %v4287_v28  ;;  %4698 = vmatprep.mubr.msk.f32.mxu1 %vm377_vm7, %v2598_v34  ;;  %v4314_v28 = vld [vmem:[%s5792_s7 + $0x60] sm:$0xff]  ;;  %v4316_v34 = vld [vmem:[%s5792_s7 + $0x70] sm:$0xff] }
 0x282   : > { %4701 = vmatprep.subr.mxu1 %v4290_v35  ;;  %v4843_v33 = vpack.c.bf16 %v4315_v29, %v4314_v28 }
 0x288   : > { %4699 = vmatmul.mubr.msk.f32.vlgmr.msra.gmra.mrb[14].mxu1 %vm377_vm7, %v2599_v40  ;;  %v4320_v40 = vld [vmem:[%s5792_s7 + $0x80] sm:$0xff] }
 0x289   : > { %4702 = vmatpush3.msra.mxu1 %v4290_v35  ;;  %4703 = vmatprep.mubr.msk.f32.mxu1 %vm377_vm7, %v2695_v42  ;;  %v4317_v35 = vld [vmem:[%s5792_s7 + $0x78] sm:$0xff]  ;;  %v4851_v42 = vpack.c.bf16 %v4321_v41, %v4320_v40 }
 0x28a   : > { %4706 = vmatprep.subr.mxu1 %v4293_v43  ;;  %v4847_v38 = vpack.c.bf16 %v4317_v35, %v4316_v34 }
 0x290   : > { %4704 = vmatmul.mubr.msk.f32.vlgmr.msra.gmra.mrb[14].mxu1 %vm377_vm7, %v2696_v47 }
 0x291   : > { %4707 = vmatpush3.msra.mxu1 %v4293_v43  ;;  %4708 = vmatprep.mubr.msk.f32.mxu1 %vm377_vm7, %v2792_v49  ;;  %v4322_v43 = vld [vmem:[%s5792_s7 + $0x90] sm:$0xff]  ;;  %v4327_v49 = vld [vmem:[%s5792_s7 + $0xa8] sm:$0xff] }
 0x292   : > { %4711 = vmatprep.subr.mxu1 %v4296_v50  ;;  %v4855_v46 = vpack.c.bf16 %v4323_v44, %v4322_v43 }
 0x298   : > { %4709 = vmatmul.mubr.msk.f32.vlgmr.msra.gmra.mrb[14].mxu1 %vm377_vm7, %v2793_v54  ;;  %v4863_v54 = vpack.c.bf16 %v4329_v52, %v4328_v51 }
 0x299   : > { %4712 = vmatpush3.msra.mxu1 %v4296_v50  ;;  %4713 = vmatprep.mubr.msk.f32.mxu1 %vm377_vm7, %v2889_v56  ;;  %v4859_v50 = vpack.c.bf16 %v4327_v49, %v4326_v48  ;;  %v4332_v56 = vld [vmem:[%s5792_s7 + $0xc0] sm:$0xff] }
 0x29a   : > { %4820 = vmatprep.subr.bf16.mxu1 %v4819_v63  ;;  %v4867_v58 = vpack.c.bf16 %v4333_v57, %v4332_v56 }
 0x2a0   : > { %4714 = vmatmul.mubr.msk.f32.vlgmr.msra.gmra.mrb[14].mxu1 %vm377_vm7, %v2890_v59  ;;  %v4334_v59 = vld [vmem:[%s5792_s7 + $0xd0] sm:$0xff] }
 0x2a1   : > { %4822 = vmatpush3.bf16.msra.mxu1 %v4819_v63  ;;  %v4871_v62 = vpack.c.bf16 %v4335_v60, %v4334_v59 }
 0x2a2   : > { %4824 = vmatprep.subr.bf16.mxu1 %v4823_v2 }
 0x2a5   : > { %4826 = vmatpush3.bf16.msra.mxu1 %v4823_v2  ;;  %v4339_v2 = vld [vmem:[%s5792_s7 + $0xe8] sm:$0xff] }
 0x2a6   : > { %4828 = vmatprep.subr.bf16.mxu1 %v4827_v5  ;;  %v4875_v3 = vpack.c.bf16 %v4339_v2, %v4338_v0 }
 0x373   : > { %v4715_v7 = vpop.f32.mrb[14].mxu1 }
 0x374   : > { %v4907_v8 = vadd.f32 %v4715_v7, %v4272_v6  ;;  %v2961_v37 = vpop.f32.mrb[15].mxu1 }
 0x375   : > { %v4908_v10 = vadd.f32 %v4272_v6, %v2961_v37  ;;  %v4345_v37 = vld [vmem:[%s5792_s7 + $0x108] sm:$0xff] }
 0x376   : > { %v2973_v11 = vmax.f32 %v4907_v8, 0.0  ;;  %v4344_v8 = vld [vmem:[%s5792_s7 + $0x100] sm:$0xff] }
 0x377   : > { %v2972_v12 = vmax.f32 %v4908_v10, 0.0  ;;  %v4346_v10 = vld [vmem:[%s5792_s7 + $0x110] sm:$0xff] }
 0x378   : > { %v3088_v13 = vcombine.high %v2973_v11, %v2973_v11  ;;  %3095 = vst.msk [vmem:[#allocation5 + $0x19] sm:$0xf] %vm3092_vm12, %v2973_v11  ;;  %v4347_v11 = vld [vmem:[%s5792_s7 + $0x118] sm:$0xff] }
 0x379   : > { %3116 = vst.msk [vmem:[#allocation5 + $0x19] sm:$0xf] %vm3113_vm13, %v3106_v1  ;;  %v3087_v14 = vcombine.high %v2972_v12, %v2972_v12 }
 0x37a   : > { %3093 = vst.msk [vmem:[#allocation5 + $0x9] sm:$0xf] %vm3092_vm12, %v2972_v12  ;;  %3096 = vst.msk [vmem:[#allocation5 + $0x21] sm:$0xf] %vm3092_vm12, %v3088_v13  ;;  %v4887_v13 = vpack.c.bf16 %v4347_v11, %v4346_v10 }
 0x37b   : > { %3114 = vst.msk [vmem:[#allocation5 + $0x9] sm:$0xf] %vm3113_vm13, %v3102_v9  ;;  %3117 = vst.msk [vmem:[#allocation5 + $0x21] sm:$0xf] %vm3113_vm13, %v3108_v15  ;;  %v4883_v9 = vpack.c.bf16 %v4345_v37, %v4344_v8 }
 0x37c   : > { %3094 = vst.msk [vmem:[#allocation5 + $0x11] sm:$0xf] %vm3092_vm12, %v3087_v14 }
 0x37d   : > { %3115 = vst.msk [vmem:[#allocation5 + $0x11] sm:$0xf] %vm3113_vm13, %v3104_v16  ;;  %v4299_v16 = vld [vmem:[%s5793_s8] ss:$0 sm:$0xff] }
 0x382   : > { %v5045_v19 = vld [vmem:[#allocation5] ss:$8 sps:$4 sm:$0xff]  }
 0x383   : > { %4724 = vmatprep.mubr.msk.f32.mxu1 %vm3139_vm14, %v5045_v19  ;;  %v5047_v23 = vld [vmem:[#allocation5 + $0x1] ss:$8 sps:$4 sm:$0xff]  }
 0x384   : > { %v5046_v21 = vld [vmem:[#allocation5 + $0x10] ss:$8 sps:$4 sm:$0xff]   ;;  %v5049_v32 = vld [vmem:[#allocation5 + $0x2] ss:$8 sps:$4 sm:$0xff]  }
 0x385   : > { %4725 = vmatmul.mubr.msk.f32.vlgmr.msra.gmra.mrb[16].mxu1 %vm3139_vm14, %v5046_v21  ;;  %v5048_v30 = vld [vmem:[#allocation5 + $0x11] ss:$8 sps:$4 sm:$0xff]   ;;  %v5058_v6 = vld [vmem:[#allocation5 + $0x20] ss:$8 sps:$4 sm:$0xff]  }
 0x386   : > { %4830 = vmatpush3.bf16.msra.mxu1 %v4827_v5  ;;  %4735 = vmatprep.mubr.msk.f32.mxu1 %vm3139_vm14, %v5047_v23  ;;  %v5050_v36 = vld [vmem:[#allocation5 + $0x12] ss:$8 sps:$4 sm:$0xff]   ;;  %v4341_v5 = vld [vmem:[%s5792_s7 + $0xf8] sm:$0xff] }
 0x387   : > { %4832 = vmatprep.subr.bf16.mxu1 %v4831_v22  ;;  %v5051_v39 = vld [vmem:[#allocation5 + $0x8] ss:$8 sps:$4 sm:$0xff]   ;;  %v5052_v45 = vld [vmem:[#allocation5 + $0x18] ss:$8 sps:$4 sm:$0xff]   ;;  %v4879_v7 = vpack.c.bf16 %v4341_v5, %v4340_v4 }
 0x388   : > { %v5053_v47 = vld [vmem:[#allocation5 + $0x9] ss:$8 sps:$4 sm:$0xff]   ;;  %v5054_v53 = vld [vmem:[#allocation5 + $0x19] ss:$8 sps:$4 sm:$0xff]  }
 0x389   : > { %v5055_v55 = vld [vmem:[#allocation5 + $0xa] ss:$8 sps:$4 sm:$0xff]   ;;  %v5056_v61 = vld [vmem:[#allocation5 + $0x1a] ss:$8 sps:$4 sm:$0xff]  }
 0x38a   : > { %4834 = vmatpush3.bf16.msra.mxu1 %v4831_v22  ;;  %v5057_v63 = vld [vmem:[#allocation5 + $0x10] ss:$8 sps:$4 sm:$0xff]   ;;  %v5060_v12 = vld [vmem:[#allocation5 + $0x21] ss:$8 sps:$4 sm:$0xff]  }
 0x38b   : > { %4836 = vmatprep.subr.bf16.mxu1 %v4835_v25  ;;  %v5059_v1 = vld [vmem:[#allocation5 + $0x11] ss:$8 sps:$4 sm:$0xff]   ;;  %v5062_v15 = vld [vmem:[#allocation5 + $0x22] ss:$8 sps:$4 sm:$0xff]  }
 0x38c   : > { %v5061_v14 = vld [vmem:[#allocation5 + $0x12] ss:$8 sps:$4 sm:$0xff]  }
 0x38d   : > { %4736 = vmatmul.mubr.msk.f32.vlgmr.msra.gmra.mrb[16].mxu1 %vm3139_vm14, %v5048_v30 }
 0x38e   : > { %4838 = vmatpush3.bf16.msra.mxu1 %v4835_v25  ;;  %4746 = vmatprep.mubr.msk.f32.mxu1 %vm3139_vm14, %v5049_v32 }
 0x38f   : > { %4840 = vmatprep.subr.bf16.mxu1 %v4839_v31 }
 0x392   : > { %4842 = vmatpush3.bf16.msra.mxu1 %v4839_v31 }
 0x393   : > { %4844 = vmatprep.subr.bf16.mxu1 %v4843_v33 }
 0x395   : > { %4747 = vmatmul.mubr.msk.f32.vlgmr.msra.gmra.mrb[16].mxu1 %vm3139_vm14, %v5050_v36 }
 0x396   : > { %4846 = vmatpush3.bf16.msra.mxu1 %v4843_v33  ;;  %4757 = vmatprep.mubr.msk.f32.mxu1 %vm3139_vm14, %v5051_v39 }
 0x397   : > { %4848 = vmatprep.subr.bf16.mxu1 %v4847_v38 }
 0x39a   : > { %4850 = vmatpush3.bf16.msra.mxu1 %v4847_v38 }
 0x39b   : > { %4852 = vmatprep.subr.bf16.mxu1 %v4851_v42 }
 0x39d   : > { %4758 = vmatmul.mubr.msk.f32.vlgmr.msra.gmra.mrb[16].mxu1 %vm3139_vm14, %v5052_v45 }
 0x39e   : > { %4854 = vmatpush3.bf16.msra.mxu1 %v4851_v42  ;;  %4768 = vmatprep.mubr.msk.f32.mxu1 %vm3139_vm14, %v5053_v47 }
 0x39f   : > { %4856 = vmatprep.subr.bf16.mxu1 %v4855_v46 }
 0x3a2   : > { %4858 = vmatpush3.bf16.msra.mxu1 %v4855_v46 }
 0x3a3   : > { %4860 = vmatprep.subr.bf16.mxu1 %v4859_v50 }
 0x3a5   : > { %4769 = vmatmul.mubr.msk.f32.vlgmr.msra.gmra.mrb[16].mxu1 %vm3139_vm14, %v5054_v53 }
 0x3a6   : > { %4862 = vmatpush3.bf16.msra.mxu1 %v4859_v50  ;;  %4779 = vmatprep.mubr.msk.f32.mxu1 %vm3139_vm14, %v5055_v55 }
 0x3a7   : > { %4864 = vmatprep.subr.bf16.mxu1 %v4863_v54 }
 0x3aa   : > { %4866 = vmatpush3.bf16.msra.mxu1 %v4863_v54 }
 0x3ab   : > { %4868 = vmatprep.subr.bf16.mxu1 %v4867_v58 }
 0x3ad   : > { %4780 = vmatmul.mubr.msk.f32.vlgmr.msra.gmra.mrb[16].mxu1 %vm3139_vm14, %v5056_v61 }
 0x3ae   : > { %4870 = vmatpush3.bf16.msra.mxu1 %v4867_v58  ;;  %4790 = vmatprep.mubr.msk.f32.mxu1 %vm3139_vm14, %v5057_v63 }
 0x3af   : > { %4872 = vmatprep.subr.bf16.mxu1 %v4871_v62 }
 0x3b2   : > { %4874 = vmatpush3.bf16.msra.mxu1 %v4871_v62 }
 0x3b3   : > { %4876 = vmatprep.subr.bf16.mxu1 %v4875_v3 }
 0x3b5   : > { %4791 = vmatmul.mubr.msk.f32.vlgmr.msra.gmra.mrb[16].mxu1 %vm3139_vm14, %v5058_v6 }
 0x3b6   : > { %4878 = vmatpush3.bf16.msra.mxu1 %v4875_v3  ;;  %4801 = vmatprep.mubr.msk.f32.mxu1 %vm3139_vm14, %v5059_v1 }
 0x3b7   : > { %4880 = vmatprep.subr.bf16.mxu1 %v4879_v7 }
 0x3ba   : > { %4882 = vmatpush3.bf16.msra.mxu1 %v4879_v7 }
 0x3bb   : > { %4884 = vmatprep.subr.bf16.mxu1 %v4883_v9 }
 0x3bd   : > { %4802 = vmatmul.mubr.msk.f32.vlgmr.msra.gmra.mrb[16].mxu1 %vm3139_vm14, %v5060_v12 }
 0x3be   : > { %4886 = vmatpush3.bf16.msra.mxu1 %v4883_v9  ;;  %4812 = vmatprep.mubr.msk.f32.mxu1 %vm3139_vm14, %v5061_v14 }
 0x3bf   : > { %4888 = vmatprep.subr.bf16.mxu1 %v4887_v13 }
 0x3c2   : > { %4890 = vmatpush3.bf16.msra.mxu1 %v4887_v13 }
 0x3c5   : > { %4813 = vmatmul.mubr.msk.f32.vlgmr.msra.gmra.mrb[16].mxu1 %vm3139_vm14, %v5062_v15 }
 0x498   : > { %v4814_v17 = vpop.f32.mrb[16].mxu1 }
 0x499   : > { %v4909_v18 = vadd.f32 %v4814_v17, %v4299_v16  ;;  %v3977_v19 = vpop.f32.mrb[17].mxu1 }
 0x49a   : > { %v4910_v20 = vadd.f32 %v4299_v16, %v3977_v19 }
 0x49b   : > { %v3989_v21 = vmax.f32 %v4909_v18, 0.0 }
 0x49c   : > { %v3988_v22 = vmax.f32 %v4910_v20, 0.0 }
 0x49d   : > { %v3993_v23 = vcombine.high %v3989_v21, %v3989_v21  ;;  %3998 = vst.msk [vmem:[%s325_s29 + $0x8] sm:$0xf] %vm3092_vm12, %v3989_v21 }
 0x49e   : > { %v3992_v24 = vcombine.high %v3988_v22, %v3988_v22  ;;  %3996 = vst.msk [vmem:[%s325_s29] sm:$0xf] %vm3092_vm12, %v3988_v22 }
 0x49f   : > { %3999 = vst.msk [vmem:[%s325_s29 + $0xc] sm:$0xf] %vm3092_vm12, %v3993_v23 }
 0x4a0   : > { %3997 = vst.msk [vmem:[%s325_s29 + $0x4] sm:$0xf] %vm3092_vm12, %v3992_v24 }
 0x4a1   : > { %5076 = shalt.err (!%p5073_p3)
}
 0x4a2   : > { %s5077_s25 = scalar_lea.hbm %s5739_s22, 256  ;;  %s5081_s16 = scalar_lea.hbm %s5794_s9, 512 }
 0x4a3   : > { %p5078_p4 = scmp.ne.s32.totalorder %s5739_s22, %s5077_s25  ;;  %p5082_p9 = scmp.lt.u32.totalorder %s5739_s22, %s5794_s9 }
 0x4a4   : > { %p5083_p10 = scmp.lt.u32.totalorder %s5081_s16, %s5077_s25  ;;  %p5085_p12 = scmp.lt.u32.totalorder %s5077_s25, %s5739_s22 }
 0x4a5   : > { %p5079_p7 = pnand %p5078_p4, %p5221_p5 }
 0x4a6   : > { %p5084_p11 = por %p5083_p10, %p5082_p9 }
 0x4a7   : > { %p5080_p8 = pneg %p5079_p7 }
 0x4a8   : > { %p5086_p13 = por %p5085_p12, %p5084_p11 }
 0x4aa   : > { %p5087_p0 = pnand %p5086_p13, %p5080_p8 }
 0x4ac   : > { %5090 = shalt.err (!%p5087_p0)
}
 0x4ad   : > { %s5131_s23 = smov 64   ;;  %s5132_s24 = smov 4  }
 0x4ae   : > { %5001 = dma.vmem_to_hbm [thread:$0]  (%p5221_p5), %s5734_s14, 256, %s5739_s22, %s5744_s13, %s5131_s23, %s5131_s23, %s5132_s24  }
 0x4af PF: > { %p5007_p1 = scmp.ge.s32.totalorder %s5125_s12, 2  ;;  %s4029_s26 = sand.u32 1, %s5113_s30  }
 0x4b0   : > { %s4030_s27 = scalar_lea.sflag [#allocation7], %s4029_s26 }
 0x4b1   : > { %p5004_p2 = pnand %p5007_p1, %p5225_p6 }
 0x4b3   : > { %5108 = dma.done.wait (!%p5004_p2), %s4030_s27, 256  }
 0x4b4   : > { %5110 = vsyncadd (!%p5004_p2), %s4030_s27, 4294967040  ;;  %p19_p3 = scmp.ge.s32.totalorder %s5208_s15, 4   ;;  %s5797_s30 = smov %s5117_s10 }
 0x4b5   : > { %s5798_s10 = smov %s5121_s11  ;;  %s5799_s11 = smov %s5219_s18 }
 0x4b6   : > { %s5800_s12 = smov %s5208_s15  ;;  %21 = sbr.rel (!%p19_p3) target bundleno = 3 (0x3), region = 262 }
 0x4bd   :  { %4035 = vsyncpa [#allocation7], 1 }
 0x4be   :  { %4037 = vsyncpa [#allocation7 + $0x1], 1 }

</bundles_post_ra>
